<compile_context>
chip_gen: v5e
topology: v5e:2x2
jax: 0.10.0
libtpu: 0.0.40
codegen_flags: <defaults>
</compile_context>

<pallas_src>
import math
import functools

import jax
import jax.numpy as jnp
from jax.experimental import pallas as pl
from jax.experimental.pallas import tpu as pltpu

# ---- model hyper-parameters (small test sizes, consistent with the module) ----
DIM = 32          # d_model (PyTorch default 256; small for the test)
OUT_DIM = 1
HEADS = 4         # must divide DIM
LAYERS = 2
DFF = 2048        # nn.TransformerEncoderLayer default dim_feedforward
EMB_DIM = 16      # ContDiffusionEmbedding dim
PROJ_DIM = 32     # ContDiffusionEmbedding proj_dim
LN_EPS = 1e-5


# --------------------------------------------------------------------------------------
# Fused kernel.  Grid = (batch, layer):
#   * batch axis "parallel"  -> each grid point works on one (S, D) sequence
#   * layer axis "arbitrary" -> hidden state carried in a VMEM scratch, per-layer
#     weights streamed in via layer-indexed BlockSpecs (auto double-buffered)
# --------------------------------------------------------------------------------------
def _fused_kernel(t_ref, x_ref, freq_ref,
                  enc_w_ref, enc_b_ref,
                  p1_w_ref, p1_b_ref, p2_w_ref, p2_b_ref,
                  te_w_ref, te_b_ref,
                  wqkv_ref, bqkv_ref, wo_ref, bo_ref,
                  ln1_g_ref, ln1_b_ref,
                  w1_ref, b1_ref, w2_ref, b2_ref,
                  ln2_g_ref, ln2_b_ref,
                  out_w_ref, out_b_ref,
                  o_ref, h_ref, *, heads):
    f32 = jnp.float32
    bf16 = jnp.bfloat16
    HP = jax.lax.Precision.HIGHEST          # only used for the tiny embedding matmuls

    l = pl.program_id(1)
    n_layers = pl.num_programs(1)

    S = x_ref.shape[0]
    D = wqkv_ref.shape[0]
    hd = D // heads
    scale = 1.0 / math.sqrt(hd)
    emb_dim = freq_ref.shape[1]

    # ---- first layer step of this sequence: time embedding + encoder Linear(2,D) ----
    @pl.when(l == 0)
    def _():
        # time embedding (scalar t: the same row for every (b, s))
        arg = t_ref[...] * freq_ref[...]                          # (1, EMB)
        s_e, c_e = jnp.sin(arg), jnp.cos(arg)
        # cat([sin, cos], -1) @ W1  ==  sin @ W1[:EMB] + cos @ W1[EMB:]
        e = (jnp.dot(s_e, p1_w_ref[:emb_dim, :], precision=HP, preferred_element_type=f32)
             + jnp.dot(c_e, p1_w_ref[emb_dim:, :], precision=HP, preferred_element_type=f32)
             + p1_b_ref[...])
        e = e * (1.0 / (1.0 + jnp.exp(-e)))                       # SiLU
        e = jnp.dot(e, p2_w_ref[...], precision=HP, preferred_element_type=f32) + p2_b_ref[...]
        e = e * (1.0 / (1.0 + jnp.exp(-e)))                       # SiLU
        t_emb = jnp.dot(e, te_w_ref[...], precision=HP,
                        preferred_element_type=f32) + te_b_ref[...]          # (1, D)

        # encoder Linear(2, D): K=2 contraction done on the VPU, fused with +t_emb
        x = x_ref[...]                                            # (S, 2)
        h_ref[...] = (x[:, 0:1] * enc_w_ref[0:1, :]
                      + x[:, 1:2] * enc_w_ref[1:2, :]
                      + enc_b_ref[...] + t_emb)                   # (S, D)

    h = h_ref[...]                                                # (S, D) f32

    # ---- one transformer encoder layer (post-norm, ReLU FFN, no dropout) ----
    # fused QKV projection: one (S, 3D) bf16 matmul, f32 accumulation
    qkv = jnp.dot(h.astype(bf16), wqkv_ref[...],
                  preferred_element_type=f32) + bqkv_ref[...]                 # (S, 3D)

    head_outs = []
    for hh in range(heads):
        lo = hh * hd
        q = qkv[:, lo:lo + hd].astype(bf16)
        k = qkv[:, D + lo:D + lo + hd].astype(bf16)
        v = qkv[:, 2 * D + lo:2 * D + lo + hd].astype(bf16)
        sc = jax.lax.dot_general(q, k, (((1,), (1,)), ((), ())),
                                 preferred_element_type=f32) * scale          # (S, S) f32
        sc = sc - jnp.max(sc, axis=-1, keepdims=True)                         # softmax in f32
        p = jnp.exp(sc)
        p = p * pl.reciprocal(jnp.sum(p, axis=-1, keepdims=True), approx=True)
        head_outs.append(jnp.dot(p.astype(bf16), v, preferred_element_type=f32))
    # merge heads (lane concat) then ONE (S, D) x (D, D) output projection
    attn = jnp.dot(jnp.concatenate(head_outs, axis=-1).astype(bf16), wo_ref[...],
                   preferred_element_type=f32) + bo_ref[...]

    # residual + LayerNorm1 (f32)
    y = h + attn
    mu = jnp.mean(y, axis=-1, keepdims=True)
    var = jnp.mean(jnp.square(y - mu), axis=-1, keepdims=True)
    y = (y - mu) * jax.lax.rsqrt(var + LN_EPS) * ln1_g_ref[...] + ln1_b_ref[...]

    # ReLU feed-forward: bf16 weights / MXU, f32 accumulation + f32 elementwise, no chunking
    hid = jnp.dot(y.astype(bf16), w1_ref[...], preferred_element_type=f32) + b1_ref[...]
    hid = jnp.maximum(hid, 0.0)
    ffn = jnp.dot(hid.astype(bf16), w2_ref[...], preferred_element_type=f32) + b2_ref[...]

    # residual + LayerNorm2 (f32)
    z = y + ffn
    mu2 = jnp.mean(z, axis=-1, keepdims=True)
    var2 = jnp.mean(jnp.square(z - mu2), axis=-1, keepdims=True)
    h_new = (z - mu2) * jax.lax.rsqrt(var2 + LN_EPS) * ln2_g_ref[...] + ln2_b_ref[...]
    h_ref[...] = h_new

    # ---- last layer: output head (out_w passed pre-transposed as (out_dim, D)) ----
    @pl.when(l == n_layers - 1)
    def _():
        out_dim = o_ref.shape[1]
        if out_dim == 1:
            # broadcast-multiply + lane reduction instead of an N=1 matmul
            o_ref[...] = (jnp.sum(h_new * out_w_ref[...], axis=-1, keepdims=True)
                          + out_b_ref[...])
        else:
            o_ref[...] = jax.lax.dot_general(
                h_new, out_w_ref[...], (((1,), (1,)), ((), ())),
                precision=HP, preferred_element_type=f32) + out_b_ref[...]


# --------------------------------------------------------------------------------------
# Parameters (deterministic synthetic init — no checkpoint). Per-layer weights stacked;
# the big MXU weights are pre-cast to bf16 once here, out_w is pre-transposed.
# --------------------------------------------------------------------------------------
def init_params(key, dim=DIM, out_dim=OUT_DIM, layers=LAYERS, dff=DFF,
                emb_dim=EMB_DIM, proj_dim=PROJ_DIM):
    keys = iter(jax.random.split(key, 16 + 16 * layers))

    def lin(kin, kout):
        w = jax.random.normal(next(keys), (kin, kout), jnp.float32) / math.sqrt(kin)
        b = 0.01 * jax.random.normal(next(keys), (1, kout), jnp.float32)
        return w, b

    p = {}
    p['freqs'] = (10.0 ** (jnp.arange(emb_dim, dtype=jnp.float32) * 4.0 / emb_dim)
                  ).reshape(1, emb_dim)
    p['enc_w'], p['enc_b'] = lin(2, dim)
    p['p1_w'], p['p1_b'] = lin(2 * emb_dim, proj_dim)
    p['p2_w'], p['p2_b'] = lin(proj_dim, proj_dim)
    p['te_w'], p['te_b'] = lin(proj_dim, dim)

    names = ('wqkv', 'bqkv', 'wo', 'bo', 'ln1_g', 'ln1_b',
             'w1', 'b1', 'w2', 'b2', 'ln2_g', 'ln2_b')
    acc = {n: [] for n in names}
    for _ in range(layers):
        wq, bq = lin(dim, dim)
        wk, bk = lin(dim, dim)
        wv, bv = lin(dim, dim)
        acc['wqkv'].append(jnp.concatenate([wq, wk, wv], axis=1))   # (D, 3D)
        acc['bqkv'].append(jnp.concatenate([bq, bk, bv], axis=1))   # (1, 3D)
        wo, bo = lin(dim, dim)
        acc['wo'].append(wo); acc['bo'].append(bo)
        acc['ln1_g'].append(jnp.ones((1, dim), jnp.float32))
        acc['ln1_b'].append(jnp.zeros((1, dim), jnp.float32))
        w1, b1 = lin(dim, dff)
        acc['w1'].append(w1); acc['b1'].append(b1)
        w2, b2 = lin(dff, dim)
        acc['w2'].append(w2); acc['b2'].append(b2)
        acc['ln2_g'].append(jnp.ones((1, dim), jnp.float32))
        acc['ln2_b'].append(jnp.zeros((1, dim), jnp.float32))
    stacked = {n: jnp.stack(v) for n, v in acc.items()}
    # pre-cast the dominant MXU weights to bf16 ONCE (half DMA bytes / VMEM residency)
    for n in ('wqkv', 'wo', 'w1', 'w2'):
        stacked[n] = stacked[n].astype(jnp.bfloat16)
    p['layers'] = stacked

    out_w, p['out_b'] = lin(dim, out_dim)
    p['out_w_t'] = out_w.T                       # pre-transposed (out_dim, D)
    return p


# --------------------------------------------------------------------------------------
# Forward (single fused Pallas call, grid = (batch, layer))
# --------------------------------------------------------------------------------------
def forward(params, x, t, *, heads=HEADS):
    B, S, in_feat = x.shape
    D = params['enc_w'].shape[1]
    out_dim = params['out_w_t'].shape[0]
    lp = params['layers']
    L = lp['wqkv'].shape[0]

    # scalar-t path: t = ones_like(x[...,:1]) * clamp(t, 0, 1)  (same value everywhere)
    t_arr = jnp.clip(jnp.full((1, 1), t, dtype=jnp.float32), 0.0, 1.0)
    x = x.astype(jnp.float32)

    def const_spec(a):                       # whole array, never re-fetched
        return pl.BlockSpec(a.shape, lambda b, l, _nd=a.ndim: (0,) * _nd)

    def layer_spec(a):                       # per-layer block, streamed along grid axis 1
        tail = a.shape[1:]
        return pl.BlockSpec((None,) + tail,
                            lambda b, l, _n=len(tail): (l,) + (0,) * _n)

    args = (t_arr, x, params['freqs'],
            params['enc_w'], params['enc_b'],
            params['p1_w'], params['p1_b'], params['p2_w'], params['p2_b'],
            params['te_w'], params['te_b'],
            lp['wqkv'], lp['bqkv'], lp['wo'], lp['bo'],
            lp['ln1_g'], lp['ln1_b'],
            lp['w1'], lp['b1'], lp['w2'], lp['b2'],
            lp['ln2_g'], lp['ln2_b'],
            params['out_w_t'], params['out_b'])

    in_specs = [
        const_spec(t_arr),
        pl.BlockSpec((None, S, in_feat), lambda b, l: (b, 0, 0)),
        const_spec(params['freqs']),
        const_spec(params['enc_w']), const_spec(params['enc_b']),
        const_spec(params['p1_w']), const_spec(params['p1_b']),
        const_spec(params['p2_w']), const_spec(params['p2_b']),
        const_spec(params['te_w']), const_spec(params['te_b']),
        layer_spec(lp['wqkv']), layer_spec(lp['bqkv']),
        layer_spec(lp['wo']), layer_spec(lp['bo']),
        layer_spec(lp['ln1_g']), layer_spec(lp['ln1_b']),
        layer_spec(lp['w1']), layer_spec(lp['b1']),
        layer_spec(lp['w2']), layer_spec(lp['b2']),
        layer_spec(lp['ln2_g']), layer_spec(lp['ln2_b']),
        const_spec(params['out_w_t']), const_spec(params['out_b']),
    ]

    out = pl.pallas_call(
        functools.partial(_fused_kernel, heads=heads),
        out_shape=jax.ShapeDtypeStruct((B, S, out_dim), jnp.float32),
        grid=(B, L),
        in_specs=in_specs,
        out_specs=pl.BlockSpec((None, S, out_dim), lambda b, l: (b, 0, 0)),
        scratch_shapes=[pltpu.VMEM((S, D), jnp.float32)],     # hidden-state carry
        compiler_params=pltpu.CompilerParams(
            dimension_semantics=("parallel", "arbitrary")),
    )(*args)
    return out


# --------------------------------------------------------------------------------------
# Pure-JAX reference (same params / semantics) for a sanity check
# --------------------------------------------------------------------------------------
def _ln(x, g, b):
    mu = jnp.mean(x, axis=-1, keepdims=True)
    var = jnp.mean(jnp.square(x - mu), axis=-1, keepdims=True)
    return (x - mu) / jnp.sqrt(var + LN_EPS) * g + b


def reference(params, x, t, *, heads=HEADS):
    f32 = jnp.float32
    HP = jax.lax.Precision.HIGHEST
    t_c = jnp.clip(jnp.float32(t), 0.0, 1.0)
    h = jnp.dot(x, params['enc_w'], precision=HP) + params['enc_b']
    arg = t_c * params['freqs']
    emb = jnp.concatenate([jnp.sin(arg), jnp.cos(arg)], axis=-1)
    e = jax.nn.silu(jnp.dot(emb, params['p1_w'], precision=HP) + params['p1_b'])
    e = jax.nn.silu(jnp.dot(e, params['p2_w'], precision=HP) + params['p2_b'])
    h = h + (jnp.dot(e, params['te_w'], precision=HP) + params['te_b'])
    B, S, D = h.shape
    hd = D // heads
    lp = params['layers']
    for l in range(lp['wqkv'].shape[0]):
        wqkv = lp['wqkv'][l].astype(f32)
        wo = lp['wo'][l].astype(f32)
        w1 = lp['w1'][l].astype(f32)
        w2 = lp['w2'][l].astype(f32)
        qkv = jnp.dot(h, wqkv, precision=HP) + lp['bqkv'][l]
        q, k, v = jnp.split(qkv, 3, axis=-1)
        q = q.reshape(B, S, heads, hd)
        k = k.reshape(B, S, heads, hd)
        v = v.reshape(B, S, heads, hd)
        scores = jnp.einsum('bqhd,bkhd->bhqk', q, k, precision=HP) / math.sqrt(hd)
        p = jax.nn.softmax(scores, axis=-1)
        o = jnp.einsum('bhqk,bkhd->bqhd', p, v, precision=HP).reshape(B, S, D)
        attn = jnp.dot(o, wo, precision=HP) + lp['bo'][l]
        y = _ln(h + attn, lp['ln1_g'][l], lp['ln1_b'][l])
        ffn = jnp.dot(jax.nn.relu(jnp.dot(y, w1, precision=HP) + lp['b1'][l]),
                      w2, precision=HP) + lp['b2'][l]
        h = _ln(y + ffn, lp['ln2_g'][l], lp['ln2_b'][l])
    return jnp.dot(h, params['out_w_t'].T, precision=HP) + params['out_b']


if __name__ == "__main__":
    key = jax.random.PRNGKey(0)
    pkey, xkey = jax.random.split(key)
    params = init_params(pkey)

    B, S = 2, 8
    x = jax.random.normal(xkey, (B, S, 2), jnp.float32)   # Linear(2, dim) expects feature=2
    t = 0.37                                              # scalar diffusion time (float path)

    out = forward(params, x, t)
    out = jax.block_until_ready(out)
    assert out.shape == (B, S, OUT_DIM), out.shape

    ref = reference(params, x, t)
    err = float(jnp.max(jnp.abs(out - ref)))
    assert err < 5e-2, f"max abs err {err}"

    print("KERNEL_OK")
</pallas_src>

<mosaic_0001>
module attributes {stable_mosaic.version = 11 : i64} {
  func.func @_fused_kernel(%arg0: i32, %arg1: i32, %arg2: memref<1x1xf32, #tpu.memory_space<vmem>>, %arg3: memref<1x8x2xf32, #tpu.memory_space<vmem>>, %arg4: memref<1x16xf32, #tpu.memory_space<vmem>>, %arg5: memref<2x32xf32, #tpu.memory_space<vmem>>, %arg6: memref<1x32xf32, #tpu.memory_space<vmem>>, %arg7: memref<32x32xf32, #tpu.memory_space<vmem>>, %arg8: memref<1x32xf32, #tpu.memory_space<vmem>>, %arg9: memref<32x32xf32, #tpu.memory_space<vmem>>, %arg10: memref<1x32xf32, #tpu.memory_space<vmem>>, %arg11: memref<32x32xf32, #tpu.memory_space<vmem>>, %arg12: memref<1x32xf32, #tpu.memory_space<vmem>>, %arg13: memref<1x32x96xbf16, #tpu.memory_space<vmem>>, %arg14: memref<1x1x96xf32, #tpu.memory_space<vmem>>, %arg15: memref<1x32x32xbf16, #tpu.memory_space<vmem>>, %arg16: memref<1x1x32xf32, #tpu.memory_space<vmem>>, %arg17: memref<1x1x32xf32, #tpu.memory_space<vmem>>, %arg18: memref<1x1x32xf32, #tpu.memory_space<vmem>>, %arg19: memref<1x32x2048xbf16, #tpu.memory_space<vmem>>, %arg20: memref<1x1x2048xf32, #tpu.memory_space<vmem>>, %arg21: memref<1x2048x32xbf16, #tpu.memory_space<vmem>>, %arg22: memref<1x1x32xf32, #tpu.memory_space<vmem>>, %arg23: memref<1x1x32xf32, #tpu.memory_space<vmem>>, %arg24: memref<1x1x32xf32, #tpu.memory_space<vmem>>, %arg25: memref<1x32xf32, #tpu.memory_space<vmem>>, %arg26: memref<1x1xf32, #tpu.memory_space<vmem>>, %arg27: memref<1x8x1xf32, #tpu.memory_space<vmem>>, %arg28: memref<8x32xf32, #tpu.memory_space<vmem>>) attributes {dimension_semantics = [#tpu.dimension_semantics<parallel>, #tpu.dimension_semantics<arbitrary>], iteration_bounds = array<i64: 2, 2>, scalar_prefetch = 0 : i64, scratch_operands = 1 : i64, tpu.core_type = #tpu.core_type<tc>, window_params = [{pipeline_mode = #tpu.pipeline_mode<synchronous>, transform_indices = @transform_0, window_bounds = array<i64: 1, 1>}, {transform_indices = @transform_1, window_bounds = array<i64: 1, 8, 2>}, {pipeline_mode = #tpu.pipeline_mode<synchronous>, transform_indices = @transform_2, window_bounds = array<i64: 1, 16>}, {pipeline_mode = #tpu.pipeline_mode<synchronous>, transform_indices = @transform_3, window_bounds = array<i64: 2, 32>}, {pipeline_mode = #tpu.pipeline_mode<synchronous>, transform_indices = @transform_4, window_bounds = array<i64: 1, 32>}, {pipeline_mode = #tpu.pipeline_mode<synchronous>, transform_indices = @transform_5, window_bounds = array<i64: 32, 32>}, {pipeline_mode = #tpu.pipeline_mode<synchronous>, transform_indices = @transform_6, window_bounds = array<i64: 1, 32>}, {pipeline_mode = #tpu.pipeline_mode<synchronous>, transform_indices = @transform_7, window_bounds = array<i64: 32, 32>}, {pipeline_mode = #tpu.pipeline_mode<synchronous>, transform_indices = @transform_8, window_bounds = array<i64: 1, 32>}, {pipeline_mode = #tpu.pipeline_mode<synchronous>, transform_indices = @transform_9, window_bounds = array<i64: 32, 32>}, {pipeline_mode = #tpu.pipeline_mode<synchronous>, transform_indices = @transform_10, window_bounds = array<i64: 1, 32>}, {transform_indices = @transform_11, window_bounds = array<i64: 1, 32, 96>}, {transform_indices = @transform_12, window_bounds = array<i64: 1, 1, 96>}, {transform_indices = @transform_13, window_bounds = array<i64: 1, 32, 32>}, {transform_indices = @transform_14, window_bounds = array<i64: 1, 1, 32>}, {transform_indices = @transform_15, window_bounds = array<i64: 1, 1, 32>}, {transform_indices = @transform_16, window_bounds = array<i64: 1, 1, 32>}, {transform_indices = @transform_17, window_bounds = array<i64: 1, 32, 2048>}, {transform_indices = @transform_18, window_bounds = array<i64: 1, 1, 2048>}, {transform_indices = @transform_19, window_bounds = array<i64: 1, 2048, 32>}, {transform_indices = @transform_20, window_bounds = array<i64: 1, 1, 32>}, {transform_indices = @transform_21, window_bounds = array<i64: 1, 1, 32>}, {transform_indices = @transform_22, window_bounds = array<i64: 1, 1, 32>}, {pipeline_mode = #tpu.pipeline_mode<synchronous>, transform_indices = @transform_23, window_bounds = array<i64: 1, 32>}, {pipeline_mode = #tpu.pipeline_mode<synchronous>, transform_indices = @transform_24, window_bounds = array<i64: 1, 1>}, {transform_indices = @transform_25, window_bounds = array<i64: 1, 8, 1>}]} {
    %c0_i32 = arith.constant 0 : i32
    %0 = arith.cmpi eq, %arg1, %c0_i32 : i32
    %1 = arith.extui %0 : i1 to i32
    %c0_i32_0 = arith.constant 0 : i32
    %2 = arith.cmpi ne, %1, %c0_i32_0 : i32
    scf.if %2 {
      %c0_75 = arith.constant 0 : index
      %c0_76 = arith.constant 0 : index
      %181 = vector.load %arg2[%c0_75, %c0_76] : memref<1x1xf32, #tpu.memory_space<vmem>>, vector<1x1xf32>
      %c0_77 = arith.constant 0 : index
      %c0_78 = arith.constant 0 : index
      %182 = vector.load %arg4[%c0_77, %c0_78] : memref<1x16xf32, #tpu.memory_space<vmem>>, vector<1x16xf32>
      %183 = vector.broadcast %181 : vector<1x1xf32> to vector<1x16xf32>
      %184 = arith.mulf %183, %182 : vector<1x16xf32>
      %185 = math.sin %184 : vector<1x16xf32>
      %186 = math.cos %184 : vector<1x16xf32>
      %c0_79 = arith.constant 0 : index
      %c0_80 = arith.constant 0 : index
      %187 = vector.load %arg7[%c0_79, %c0_80] : memref<32x32xf32, #tpu.memory_space<vmem>>, vector<16x32xf32>
      %cst_81 = arith.constant dense<0.000000e+00> : vector<1x32xf32>
      %188 = tpu.matmul %185, %187, %cst_81 {dimension_numbers = #tpu.dot_dimension_numbers<[1], [0], [0], [1], [0, 0, 1, 1], [], []>, precision = #tpu.contract_precision<fp32>} : vector<1x16xf32>, vector<16x32xf32>, vector<1x32xf32> -> vector<1x32xf32>
      %c16 = arith.constant 16 : index
      %c0_82 = arith.constant 0 : index
      %189 = vector.load %arg7[%c16, %c0_82] : memref<32x32xf32, #tpu.memory_space<vmem>>, vector<16x32xf32>
      %cst_83 = arith.constant dense<0.000000e+00> : vector<1x32xf32>
      %190 = tpu.matmul %186, %189, %cst_83 {dimension_numbers = #tpu.dot_dimension_numbers<[1], [0], [0], [1], [0, 0, 1, 1], [], []>, precision = #tpu.contract_precision<fp32>} : vector<1x16xf32>, vector<16x32xf32>, vector<1x32xf32> -> vector<1x32xf32>
      %191 = arith.addf %188, %190 : vector<1x32xf32>
      %c0_84 = arith.constant 0 : index
      %c0_85 = arith.constant 0 : index
      %192 = vector.load %arg8[%c0_84, %c0_85] : memref<1x32xf32, #tpu.memory_space<vmem>>, vector<1x32xf32>
      %193 = arith.addf %191, %192 : vector<1x32xf32>
      %cst_86 = arith.constant 0.000000e+00 : f32
      %194 = vector.broadcast %cst_86 : f32 to vector<1x32xf32>
      %195 = arith.subf %194, %193 : vector<1x32xf32>
      %196 = math.exp %195 : vector<1x32xf32>
      %cst_87 = arith.constant 1.000000e+00 : f32
      %197 = vector.broadcast %cst_87 : f32 to vector<1x32xf32>
      %198 = arith.addf %197, %196 : vector<1x32xf32>
      %cst_88 = arith.constant 1.000000e+00 : f32
      %199 = vector.broadcast %cst_88 : f32 to vector<1x32xf32>
      %200 = arith.divf %199, %198 : vector<1x32xf32>
      %201 = arith.mulf %193, %200 : vector<1x32xf32>
      %c0_89 = arith.constant 0 : index
      %c0_90 = arith.constant 0 : index
      %202 = vector.load %arg9[%c0_89, %c0_90] : memref<32x32xf32, #tpu.memory_space<vmem>>, vector<32x32xf32>
      %cst_91 = arith.constant dense<0.000000e+00> : vector<1x32xf32>
      %203 = tpu.matmul %201, %202, %cst_91 {dimension_numbers = #tpu.dot_dimension_numbers<[1], [0], [0], [1], [0, 0, 1, 1], [], []>, precision = #tpu.contract_precision<fp32>} : vector<1x32xf32>, vector<32x32xf32>, vector<1x32xf32> -> vector<1x32xf32>
      %c0_92 = arith.constant 0 : index
      %c0_93 = arith.constant 0 : index
      %204 = vector.load %arg10[%c0_92, %c0_93] : memref<1x32xf32, #tpu.memory_space<vmem>>, vector<1x32xf32>
      %205 = arith.addf %203, %204 : vector<1x32xf32>
      %cst_94 = arith.constant 0.000000e+00 : f32
      %206 = vector.broadcast %cst_94 : f32 to vector<1x32xf32>
      %207 = arith.subf %206, %205 : vector<1x32xf32>
      %208 = math.exp %207 : vector<1x32xf32>
      %cst_95 = arith.constant 1.000000e+00 : f32
      %209 = vector.broadcast %cst_95 : f32 to vector<1x32xf32>
      %210 = arith.addf %209, %208 : vector<1x32xf32>
      %cst_96 = arith.constant 1.000000e+00 : f32
      %211 = vector.broadcast %cst_96 : f32 to vector<1x32xf32>
      %212 = arith.divf %211, %210 : vector<1x32xf32>
      %213 = arith.mulf %205, %212 : vector<1x32xf32>
      %c0_97 = arith.constant 0 : index
      %c0_98 = arith.constant 0 : index
      %214 = vector.load %arg11[%c0_97, %c0_98] : memref<32x32xf32, #tpu.memory_space<vmem>>, vector<32x32xf32>
      %cst_99 = arith.constant dense<0.000000e+00> : vector<1x32xf32>
      %215 = tpu.matmul %213, %214, %cst_99 {dimension_numbers = #tpu.dot_dimension_numbers<[1], [0], [0], [1], [0, 0, 1, 1], [], []>, precision = #tpu.contract_precision<fp32>} : vector<1x32xf32>, vector<32x32xf32>, vector<1x32xf32> -> vector<1x32xf32>
      %c0_100 = arith.constant 0 : index
      %c0_101 = arith.constant 0 : index
      %216 = vector.load %arg12[%c0_100, %c0_101] : memref<1x32xf32, #tpu.memory_space<vmem>>, vector<1x32xf32>
      %217 = arith.addf %215, %216 : vector<1x32xf32>
      %c0_102 = arith.constant 0 : index
      %c0_103 = arith.constant 0 : index
      %c0_104 = arith.constant 0 : index
      %218 = vector.load %arg3[%c0_102, %c0_103, %c0_104] : memref<1x8x2xf32, #tpu.memory_space<vmem>>, vector<1x8x2xf32>
      %219 = vector.shape_cast %218 : vector<1x8x2xf32> to vector<8x2xf32>
      %220 = vector.extract_strided_slice %219 {offsets = [0, 0], sizes = [8, 1], strides = [1, 1]} : vector<8x2xf32> to vector<8x1xf32>
      %c0_105 = arith.constant 0 : index
      %c0_106 = arith.constant 0 : index
      %221 = vector.load %arg5[%c0_105, %c0_106] : memref<2x32xf32, #tpu.memory_space<vmem>>, vector<1x32xf32>
      %222 = vector.broadcast %220 : vector<8x1xf32> to vector<8x32xf32>
      %223 = vector.broadcast %221 : vector<1x32xf32> to vector<8x32xf32>
      %224 = arith.mulf %222, %223 : vector<8x32xf32>
      %225 = vector.extract_strided_slice %219 {offsets = [0, 1], sizes = [8, 1], strides = [1, 1]} : vector<8x2xf32> to vector<8x1xf32>
      %c1 = arith.constant 1 : index
      %c0_107 = arith.constant 0 : index
      %226 = vector.load %arg5[%c1, %c0_107] : memref<2x32xf32, #tpu.memory_space<vmem>>, vector<1x32xf32>
      %227 = vector.broadcast %225 : vector<8x1xf32> to vector<8x32xf32>
      %228 = vector.broadcast %226 : vector<1x32xf32> to vector<8x32xf32>
      %229 = arith.mulf %227, %228 : vector<8x32xf32>
      %230 = arith.addf %224, %229 : vector<8x32xf32>
      %c0_108 = arith.constant 0 : index
      %c0_109 = arith.constant 0 : index
      %231 = vector.load %arg6[%c0_108, %c0_109] : memref<1x32xf32, #tpu.memory_space<vmem>>, vector<1x32xf32>
      %232 = vector.broadcast %231 : vector<1x32xf32> to vector<8x32xf32>
      %233 = arith.addf %230, %232 : vector<8x32xf32>
      %234 = vector.broadcast %217 : vector<1x32xf32> to vector<8x32xf32>
      %235 = arith.addf %233, %234 : vector<8x32xf32>
      %c0_110 = arith.constant 0 : index
      %c0_111 = arith.constant 0 : index
      %236 = vector.load %arg28[%c0_110, %c0_111] : memref<8x32xf32, #tpu.memory_space<vmem>>, vector<8x32xf32>
      tpu.vector_store %arg28[%c0_110, %c0_111], %235 {strides = array<i32>} : memref<8x32xf32, #tpu.memory_space<vmem>>, vector<8x32xf32>,
    } else {
    }
    %c0 = arith.constant 0 : index
    %c0_1 = arith.constant 0 : index
    %3 = vector.load %arg28[%c0, %c0_1] : memref<8x32xf32, #tpu.memory_space<vmem>>, vector<8x32xf32>
    %4 = arith.truncf %3 : vector<8x32xf32> to vector<8x32xbf16>
    %c0_2 = arith.constant 0 : index
    %c0_3 = arith.constant 0 : index
    %c0_4 = arith.constant 0 : index
    %5 = vector.load %arg13[%c0_2, %c0_3, %c0_4] : memref<1x32x96xbf16, #tpu.memory_space<vmem>>, vector<1x32x96xbf16>
    %6 = vector.shape_cast %5 : vector<1x32x96xbf16> to vector<32x96xbf16>
    %cst = arith.constant dense<0.000000e+00> : vector<8x96xf32>
    %7 = tpu.matmul %4, %6, %cst {dimension_numbers = #tpu.dot_dimension_numbers<[1], [0], [0], [1], [0, 0, 1, 1], [], []>} : vector<8x32xbf16>, vector<32x96xbf16>, vector<8x96xf32> -> vector<8x96xf32>
    %c0_5 = arith.constant 0 : index
    %c0_6 = arith.constant 0 : index
    %c0_7 = arith.constant 0 : index
    %8 = vector.load %arg14[%c0_5, %c0_6, %c0_7] : memref<1x1x96xf32, #tpu.memory_space<vmem>>, vector<1x1x96xf32>
    %9 = vector.shape_cast %8 : vector<1x1x96xf32> to vector<1x96xf32>
    %10 = vector.broadcast %9 : vector<1x96xf32> to vector<8x96xf32>
    %11 = arith.addf %7, %10 : vector<8x96xf32>
    %12 = vector.extract_strided_slice %11 {offsets = [0, 0], sizes = [8, 8], strides = [1, 1]} : vector<8x96xf32> to vector<8x8xf32>
    %13 = arith.truncf %12 : vector<8x8xf32> to vector<8x8xbf16>
    %14 = vector.extract_strided_slice %11 {offsets = [0, 32], sizes = [8, 8], strides = [1, 1]} : vector<8x96xf32> to vector<8x8xf32>
    %15 = arith.truncf %14 : vector<8x8xf32> to vector<8x8xbf16>
    %16 = vector.extract_strided_slice %11 {offsets = [0, 64], sizes = [8, 8], strides = [1, 1]} : vector<8x96xf32> to vector<8x8xf32>
    %17 = arith.truncf %16 : vector<8x8xf32> to vector<8x8xbf16>
    %cst_8 = arith.constant dense<0.000000e+00> : vector<8x8xf32>
    %18 = tpu.matmul %13, %15, %cst_8 {dimension_numbers = #tpu.dot_dimension_numbers<[1], [1], [0], [0], [0, 0, 1, 0], [], []>} : vector<8x8xbf16>, vector<8x8xbf16>, vector<8x8xf32> -> vector<8x8xf32>
    %cst_9 = arith.constant 0.353553385 : f32
    %19 = vector.broadcast %cst_9 : f32 to vector<8x8xf32>
    %20 = arith.mulf %18, %19 : vector<8x8xf32>
    %cst_10 = arith.constant dense<0xFF800000> : vector<8xf32>
    %21 = vector.multi_reduction <maximumf>, %20, %cst_10 [1] : vector<8x8xf32> to vector<8xf32>
    %22 = vector.shape_cast %21 : vector<8xf32> to vector<8x1xf32>
    %23 = vector.broadcast %22 : vector<8x1xf32> to vector<8x8xf32>
    %24 = arith.subf %20, %23 : vector<8x8xf32>
    %25 = math.exp %24 : vector<8x8xf32>
    %cst_11 = arith.constant dense<0.000000e+00> : vector<8xf32>
    %26 = vector.multi_reduction <add>, %25, %cst_11 [1] : vector<8x8xf32> to vector<8xf32>
    %27 = vector.shape_cast %26 : vector<8xf32> to vector<8x1xf32>
    %28 = tpu.reciprocal %27 {approx = true} : vector<8x1xf32> -> vector<8x1xf32>
    %29 = vector.broadcast %28 : vector<8x1xf32> to vector<8x8xf32>
    %30 = arith.mulf %25, %29 : vector<8x8xf32>
    %31 = arith.truncf %30 : vector<8x8xf32> to vector<8x8xbf16>
    %cst_12 = arith.constant dense<0.000000e+00> : vector<8x8xf32>
    %32 = tpu.matmul %31, %17, %cst_12 {dimension_numbers = #tpu.dot_dimension_numbers<[1], [0], [0], [1], [0, 0, 1, 1], [], []>} : vector<8x8xbf16>, vector<8x8xbf16>, vector<8x8xf32> -> vector<8x8xf32>
    %33 = vector.extract_strided_slice %11 {offsets = [0, 8], sizes = [8, 8], strides = [1, 1]} : vector<8x96xf32> to vector<8x8xf32>
    %34 = arith.truncf %33 : vector<8x8xf32> to vector<8x8xbf16>
    %35 = vector.extract_strided_slice %11 {offsets = [0, 40], sizes = [8, 8], strides = [1, 1]} : vector<8x96xf32> to vector<8x8xf32>
    %36 = arith.truncf %35 : vector<8x8xf32> to vector<8x8xbf16>
    %37 = vector.extract_strided_slice %11 {offsets = [0, 72], sizes = [8, 8], strides = [1, 1]} : vector<8x96xf32> to vector<8x8xf32>
    %38 = arith.truncf %37 : vector<8x8xf32> to vector<8x8xbf16>
    %cst_13 = arith.constant dense<0.000000e+00> : vector<8x8xf32>
    %39 = tpu.matmul %34, %36, %cst_13 {dimension_numbers = #tpu.dot_dimension_numbers<[1], [1], [0], [0], [0, 0, 1, 0], [], []>} : vector<8x8xbf16>, vector<8x8xbf16>, vector<8x8xf32> -> vector<8x8xf32>
    %cst_14 = arith.constant 0.353553385 : f32
    %40 = vector.broadcast %cst_14 : f32 to vector<8x8xf32>
    %41 = arith.mulf %39, %40 : vector<8x8xf32>
    %cst_15 = arith.constant dense<0xFF800000> : vector<8xf32>
    %42 = vector.multi_reduction <maximumf>, %41, %cst_15 [1] : vector<8x8xf32> to vector<8xf32>
    %43 = vector.shape_cast %42 : vector<8xf32> to vector<8x1xf32>
    %44 = vector.broadcast %43 : vector<8x1xf32> to vector<8x8xf32>
    %45 = arith.subf %41, %44 : vector<8x8xf32>
    %46 = math.exp %45 : vector<8x8xf32>
    %cst_16 = arith.constant dense<0.000000e+00> : vector<8xf32>
    %47 = vector.multi_reduction <add>, %46, %cst_16 [1] : vector<8x8xf32> to vector<8xf32>
    %48 = vector.shape_cast %47 : vector<8xf32> to vector<8x1xf32>
    %49 = tpu.reciprocal %48 {approx = true} : vector<8x1xf32> -> vector<8x1xf32>
    %50 = vector.broadcast %49 : vector<8x1xf32> to vector<8x8xf32>
    %51 = arith.mulf %46, %50 : vector<8x8xf32>
    %52 = arith.truncf %51 : vector<8x8xf32> to vector<8x8xbf16>
    %cst_17 = arith.constant dense<0.000000e+00> : vector<8x8xf32>
    %53 = tpu.matmul %52, %38, %cst_17 {dimension_numbers = #tpu.dot_dimension_numbers<[1], [0], [0], [1], [0, 0, 1, 1], [], []>} : vector<8x8xbf16>, vector<8x8xbf16>, vector<8x8xf32> -> vector<8x8xf32>
    %54 = vector.extract_strided_slice %11 {offsets = [0, 16], sizes = [8, 8], strides = [1, 1]} : vector<8x96xf32> to vector<8x8xf32>
    %55 = arith.truncf %54 : vector<8x8xf32> to vector<8x8xbf16>
    %56 = vector.extract_strided_slice %11 {offsets = [0, 48], sizes = [8, 8], strides = [1, 1]} : vector<8x96xf32> to vector<8x8xf32>
    %57 = arith.truncf %56 : vector<8x8xf32> to vector<8x8xbf16>
    %58 = vector.extract_strided_slice %11 {offsets = [0, 80], sizes = [8, 8], strides = [1, 1]} : vector<8x96xf32> to vector<8x8xf32>
    %59 = arith.truncf %58 : vector<8x8xf32> to vector<8x8xbf16>
    %cst_18 = arith.constant dense<0.000000e+00> : vector<8x8xf32>
    %60 = tpu.matmul %55, %57, %cst_18 {dimension_numbers = #tpu.dot_dimension_numbers<[1], [1], [0], [0], [0, 0, 1, 0], [], []>} : vector<8x8xbf16>, vector<8x8xbf16>, vector<8x8xf32> -> vector<8x8xf32>
    %cst_19 = arith.constant 0.353553385 : f32
    %61 = vector.broadcast %cst_19 : f32 to vector<8x8xf32>
    %62 = arith.mulf %60, %61 : vector<8x8xf32>
    %cst_20 = arith.constant dense<0xFF800000> : vector<8xf32>
    %63 = vector.multi_reduction <maximumf>, %62, %cst_20 [1] : vector<8x8xf32> to vector<8xf32>
    %64 = vector.shape_cast %63 : vector<8xf32> to vector<8x1xf32>
    %65 = vector.broadcast %64 : vector<8x1xf32> to vector<8x8xf32>
    %66 = arith.subf %62, %65 : vector<8x8xf32>
    %67 = math.exp %66 : vector<8x8xf32>
    %cst_21 = arith.constant dense<0.000000e+00> : vector<8xf32>
    %68 = vector.multi_reduction <add>, %67, %cst_21 [1] : vector<8x8xf32> to vector<8xf32>
    %69 = vector.shape_cast %68 : vector<8xf32> to vector<8x1xf32>
    %70 = tpu.reciprocal %69 {approx = true} : vector<8x1xf32> -> vector<8x1xf32>
    %71 = vector.broadcast %70 : vector<8x1xf32> to vector<8x8xf32>
    %72 = arith.mulf %67, %71 : vector<8x8xf32>
    %73 = arith.truncf %72 : vector<8x8xf32> to vector<8x8xbf16>
    %cst_22 = arith.constant dense<0.000000e+00> : vector<8x8xf32>
    %74 = tpu.matmul %73, %59, %cst_22 {dimension_numbers = #tpu.dot_dimension_numbers<[1], [0], [0], [1], [0, 0, 1, 1], [], []>} : vector<8x8xbf16>, vector<8x8xbf16>, vector<8x8xf32> -> vector<8x8xf32>
    %75 = vector.extract_strided_slice %11 {offsets = [0, 24], sizes = [8, 8], strides = [1, 1]} : vector<8x96xf32> to vector<8x8xf32>
    %76 = arith.truncf %75 : vector<8x8xf32> to vector<8x8xbf16>
    %77 = vector.extract_strided_slice %11 {offsets = [0, 56], sizes = [8, 8], strides = [1, 1]} : vector<8x96xf32> to vector<8x8xf32>
    %78 = arith.truncf %77 : vector<8x8xf32> to vector<8x8xbf16>
    %79 = vector.extract_strided_slice %11 {offsets = [0, 88], sizes = [8, 8], strides = [1, 1]} : vector<8x96xf32> to vector<8x8xf32>
    %80 = arith.truncf %79 : vector<8x8xf32> to vector<8x8xbf16>
    %cst_23 = arith.constant dense<0.000000e+00> : vector<8x8xf32>
    %81 = tpu.matmul %76, %78, %cst_23 {dimension_numbers = #tpu.dot_dimension_numbers<[1], [1], [0], [0], [0, 0, 1, 0], [], []>} : vector<8x8xbf16>, vector<8x8xbf16>, vector<8x8xf32> -> vector<8x8xf32>
    %cst_24 = arith.constant 0.353553385 : f32
    %82 = vector.broadcast %cst_24 : f32 to vector<8x8xf32>
    %83 = arith.mulf %81, %82 : vector<8x8xf32>
    %cst_25 = arith.constant dense<0xFF800000> : vector<8xf32>
    %84 = vector.multi_reduction <maximumf>, %83, %cst_25 [1] : vector<8x8xf32> to vector<8xf32>
    %85 = vector.shape_cast %84 : vector<8xf32> to vector<8x1xf32>
    %86 = vector.broadcast %85 : vector<8x1xf32> to vector<8x8xf32>
    %87 = arith.subf %83, %86 : vector<8x8xf32>
    %88 = math.exp %87 : vector<8x8xf32>
    %cst_26 = arith.constant dense<0.000000e+00> : vector<8xf32>
    %89 = vector.multi_reduction <add>, %88, %cst_26 [1] : vector<8x8xf32> to vector<8xf32>
    %90 = vector.shape_cast %89 : vector<8xf32> to vector<8x1xf32>
    %91 = tpu.reciprocal %90 {approx = true} : vector<8x1xf32> -> vector<8x1xf32>
    %92 = vector.broadcast %91 : vector<8x1xf32> to vector<8x8xf32>
    %93 = arith.mulf %88, %92 : vector<8x8xf32>
    %94 = arith.truncf %93 : vector<8x8xf32> to vector<8x8xbf16>
    %cst_27 = arith.constant dense<0.000000e+00> : vector<8x8xf32>
    %95 = tpu.matmul %94, %80, %cst_27 {dimension_numbers = #tpu.dot_dimension_numbers<[1], [0], [0], [1], [0, 0, 1, 1], [], []>} : vector<8x8xbf16>, vector<8x8xbf16>, vector<8x8xf32> -> vector<8x8xf32>
    %96 = tpu.concatenate %32, %53, %74, %95 in 1 : vector<8x8xf32>, vector<8x8xf32>, vector<8x8xf32>, vector<8x8xf32> -> vector<8x32xf32>
    %97 = arith.truncf %96 : vector<8x32xf32> to vector<8x32xbf16>
    %c0_28 = arith.constant 0 : index
    %c0_29 = arith.constant 0 : index
    %c0_30 = arith.constant 0 : index
    %98 = vector.load %arg15[%c0_28, %c0_29, %c0_30] : memref<1x32x32xbf16, #tpu.memory_space<vmem>>, vector<1x32x32xbf16>
    %99 = vector.shape_cast %98 : vector<1x32x32xbf16> to vector<32x32xbf16>
    %cst_31 = arith.constant dense<0.000000e+00> : vector<8x32xf32>
    %100 = tpu.matmul %97, %99, %cst_31 {dimension_numbers = #tpu.dot_dimension_numbers<[1], [0], [0], [1], [0, 0, 1, 1], [], []>} : vector<8x32xbf16>, vector<32x32xbf16>, vector<8x32xf32> -> vector<8x32xf32>
    %c0_32 = arith.constant 0 : index
    %c0_33 = arith.constant 0 : index
    %c0_34 = arith.constant 0 : index
    %101 = vector.load %arg16[%c0_32, %c0_33, %c0_34] : memref<1x1x32xf32, #tpu.memory_space<vmem>>, vector<1x1x32xf32>
    %102 = vector.shape_cast %101 : vector<1x1x32xf32> to vector<1x32xf32>
    %103 = vector.broadcast %102 : vector<1x32xf32> to vector<8x32xf32>
    %104 = arith.addf %100, %103 : vector<8x32xf32>
    %105 = arith.addf %3, %104 : vector<8x32xf32>
    %cst_35 = arith.constant dense<0.000000e+00> : vector<8xf32>
    %106 = vector.multi_reduction <add>, %105, %cst_35 [1] : vector<8x32xf32> to vector<8xf32>
    %107 = vector.shape_cast %106 : vector<8xf32> to vector<8x1xf32>
    %cst_36 = arith.constant 3.200000e+01 : f32
    %108 = vector.broadcast %cst_36 : f32 to vector<8x1xf32>
    %109 = arith.divf %107, %108 : vector<8x1xf32>
    %110 = vector.broadcast %109 : vector<8x1xf32> to vector<8x32xf32>
    %111 = arith.subf %105, %110 : vector<8x32xf32>
    %112 = arith.mulf %111, %111 : vector<8x32xf32>
    %cst_37 = arith.constant dense<0.000000e+00> : vector<8xf32>
    %113 = vector.multi_reduction <add>, %112, %cst_37 [1] : vector<8x32xf32> to vector<8xf32>
    %114 = vector.shape_cast %113 : vector<8xf32> to vector<8x1xf32>
    %cst_38 = arith.constant 3.200000e+01 : f32
    %115 = vector.broadcast %cst_38 : f32 to vector<8x1xf32>
    %116 = arith.divf %114, %115 : vector<8x1xf32>
    %117 = vector.broadcast %109 : vector<8x1xf32> to vector<8x32xf32>
    %118 = arith.subf %105, %117 : vector<8x32xf32>
    %cst_39 = arith.constant 9.99999974E-6 : f32
    %119 = vector.broadcast %cst_39 : f32 to vector<8x1xf32>
    %120 = arith.addf %116, %119 : vector<8x1xf32>
    %121 = math.rsqrt %120 : vector<8x1xf32>
    %122 = vector.broadcast %121 : vector<8x1xf32> to vector<8x32xf32>
    %123 = arith.mulf %118, %122 : vector<8x32xf32>
    %c0_40 = arith.constant 0 : index
    %c0_41 = arith.constant 0 : index
    %c0_42 = arith.constant 0 : index
    %124 = vector.load %arg17[%c0_40, %c0_41, %c0_42] : memref<1x1x32xf32, #tpu.memory_space<vmem>>, vector<1x1x32xf32>
    %125 = vector.shape_cast %124 : vector<1x1x32xf32> to vector<1x32xf32>
    %126 = vector.broadcast %125 : vector<1x32xf32> to vector<8x32xf32>
    %127 = arith.mulf %123, %126 : vector<8x32xf32>
    %c0_43 = arith.constant 0 : index
    %c0_44 = arith.constant 0 : index
    %c0_45 = arith.constant 0 : index
    %128 = vector.load %arg18[%c0_43, %c0_44, %c0_45] : memref<1x1x32xf32, #tpu.memory_space<vmem>>, vector<1x1x32xf32>
    %129 = vector.shape_cast %128 : vector<1x1x32xf32> to vector<1x32xf32>
    %130 = vector.broadcast %129 : vector<1x32xf32> to vector<8x32xf32>
    %131 = arith.addf %127, %130 : vector<8x32xf32>
    %132 = arith.truncf %131 : vector<8x32xf32> to vector<8x32xbf16>
    %c0_46 = arith.constant 0 : index
    %c0_47 = arith.constant 0 : index
    %c0_48 = arith.constant 0 : index
    %133 = vector.load %arg19[%c0_46, %c0_47, %c0_48] : memref<1x32x2048xbf16, #tpu.memory_space<vmem>>, vector<1x32x2048xbf16>
    %134 = vector.shape_cast %133 : vector<1x32x2048xbf16> to vector<32x2048xbf16>
    %cst_49 = arith.constant dense<0.000000e+00> : vector<8x2048xf32>
    %135 = tpu.matmul %132, %134, %cst_49 {dimension_numbers = #tpu.dot_dimension_numbers<[1], [0], [0], [1], [0, 0, 1, 1], [], []>} : vector<8x32xbf16>, vector<32x2048xbf16>, vector<8x2048xf32> -> vector<8x2048xf32>
    %c0_50 = arith.constant 0 : index
    %c0_51 = arith.constant 0 : index
    %c0_52 = arith.constant 0 : index
    %136 = vector.load %arg20[%c0_50, %c0_51, %c0_52] : memref<1x1x2048xf32, #tpu.memory_space<vmem>>, vector<1x1x2048xf32>
    %137 = vector.shape_cast %136 : vector<1x1x2048xf32> to vector<1x2048xf32>
    %138 = vector.broadcast %137 : vector<1x2048xf32> to vector<8x2048xf32>
    %139 = arith.addf %135, %138 : vector<8x2048xf32>
    %cst_53 = arith.constant 0.000000e+00 : f32
    %140 = vector.broadcast %cst_53 : f32 to vector<8x2048xf32>
    %141 = arith.maximumf %139, %140 : vector<8x2048xf32>
    %142 = arith.truncf %141 : vector<8x2048xf32> to vector<8x2048xbf16>
    %c0_54 = arith.constant 0 : index
    %c0_55 = arith.constant 0 : index
    %c0_56 = arith.constant 0 : index
    %143 = vector.load %arg21[%c0_54, %c0_55, %c0_56] : memref<1x2048x32xbf16, #tpu.memory_space<vmem>>, vector<1x2048x32xbf16>
    %144 = vector.shape_cast %143 : vector<1x2048x32xbf16> to vector<2048x32xbf16>
    %cst_57 = arith.constant dense<0.000000e+00> : vector<8x32xf32>
    %145 = tpu.matmul %142, %144, %cst_57 {dimension_numbers = #tpu.dot_dimension_numbers<[1], [0], [0], [1], [0, 0, 1, 1], [], []>} : vector<8x2048xbf16>, vector<2048x32xbf16>, vector<8x32xf32> -> vector<8x32xf32>
    %c0_58 = arith.constant 0 : index
    %c0_59 = arith.constant 0 : index
    %c0_60 = arith.constant 0 : index
    %146 = vector.load %arg22[%c0_58, %c0_59, %c0_60] : memref<1x1x32xf32, #tpu.memory_space<vmem>>, vector<1x1x32xf32>
    %147 = vector.shape_cast %146 : vector<1x1x32xf32> to vector<1x32xf32>
    %148 = vector.broadcast %147 : vector<1x32xf32> to vector<8x32xf32>
    %149 = arith.addf %145, %148 : vector<8x32xf32>
    %150 = arith.addf %131, %149 : vector<8x32xf32>
    %cst_61 = arith.constant dense<0.000000e+00> : vector<8xf32>
    %151 = vector.multi_reduction <add>, %150, %cst_61 [1] : vector<8x32xf32> to vector<8xf32>
    %152 = vector.shape_cast %151 : vector<8xf32> to vector<8x1xf32>
    %cst_62 = arith.constant 3.200000e+01 : f32
    %153 = vector.broadcast %cst_62 : f32 to vector<8x1xf32>
    %154 = arith.divf %152, %153 : vector<8x1xf32>
    %155 = vector.broadcast %154 : vector<8x1xf32> to vector<8x32xf32>
    %156 = arith.subf %150, %155 : vector<8x32xf32>
    %157 = arith.mulf %156, %156 : vector<8x32xf32>
    %cst_63 = arith.constant dense<0.000000e+00> : vector<8xf32>
    %158 = vector.multi_reduction <add>, %157, %cst_63 [1] : vector<8x32xf32> to vector<8xf32>
    %159 = vector.shape_cast %158 : vector<8xf32> to vector<8x1xf32>
    %cst_64 = arith.constant 3.200000e+01 : f32
    %160 = vector.broadcast %cst_64 : f32 to vector<8x1xf32>
    %161 = arith.divf %159, %160 : vector<8x1xf32>
    %162 = vector.broadcast %154 : vector<8x1xf32> to vector<8x32xf32>
    %163 = arith.subf %150, %162 : vector<8x32xf32>
    %cst_65 = arith.constant 9.99999974E-6 : f32
    %164 = vector.broadcast %cst_65 : f32 to vector<8x1xf32>
    %165 = arith.addf %161, %164 : vector<8x1xf32>
    %166 = math.rsqrt %165 : vector<8x1xf32>
    %167 = vector.broadcast %166 : vector<8x1xf32> to vector<8x32xf32>
    %168 = arith.mulf %163, %167 : vector<8x32xf32>
    %c0_66 = arith.constant 0 : index
    %c0_67 = arith.constant 0 : index
    %c0_68 = arith.constant 0 : index
    %169 = vector.load %arg23[%c0_66, %c0_67, %c0_68] : memref<1x1x32xf32, #tpu.memory_space<vmem>>, vector<1x1x32xf32>
    %170 = vector.shape_cast %169 : vector<1x1x32xf32> to vector<1x32xf32>
    %171 = vector.broadcast %170 : vector<1x32xf32> to vector<8x32xf32>
    %172 = arith.mulf %168, %171 : vector<8x32xf32>
    %c0_69 = arith.constant 0 : index
    %c0_70 = arith.constant 0 : index
    %c0_71 = arith.constant 0 : index
    %173 = vector.load %arg24[%c0_69, %c0_70, %c0_71] : memref<1x1x32xf32, #tpu.memory_space<vmem>>, vector<1x1x32xf32>
    %174 = vector.shape_cast %173 : vector<1x1x32xf32> to vector<1x32xf32>
    %175 = vector.broadcast %174 : vector<1x32xf32> to vector<8x32xf32>
    %176 = arith.addf %172, %175 : vector<8x32xf32>
    %c0_72 = arith.constant 0 : index
    %c0_73 = arith.constant 0 : index
    %177 = vector.load %arg28[%c0_72, %c0_73] : memref<8x32xf32, #tpu.memory_space<vmem>>, vector<8x32xf32>
    tpu.vector_store %arg28[%c0_72, %c0_73], %176 {strides = array<i32>} : memref<8x32xf32, #tpu.memory_space<vmem>>, vector<8x32xf32>,
    %c1_i32 = arith.constant 1 : i32
    %178 = arith.cmpi eq, %arg1, %c1_i32 : i32
    %179 = arith.extui %178 : i1 to i32
    %c0_i32_74 = arith.constant 0 : i32
    %180 = arith.cmpi ne, %179, %c0_i32_74 : i32
    scf.if %180 {
      %c0_75 = arith.constant 0 : index
      %c0_76 = arith.constant 0 : index
      %181 = vector.load %arg25[%c0_75, %c0_76] : memref<1x32xf32, #tpu.memory_space<vmem>>, vector<1x32xf32>
      %182 = vector.broadcast %181 : vector<1x32xf32> to vector<8x32xf32>
      %183 = arith.mulf %176, %182 : vector<8x32xf32>
      %cst_77 = arith.constant dense<0.000000e+00> : vector<8xf32>
      %184 = vector.multi_reduction <add>, %183, %cst_77 [1] : vector<8x32xf32> to vector<8xf32>
      %185 = vector.shape_cast %184 : vector<8xf32> to vector<8x1xf32>
      %c0_78 = arith.constant 0 : index
      %c0_79 = arith.constant 0 : index
      %186 = vector.load %arg26[%c0_78, %c0_79] : memref<1x1xf32, #tpu.memory_space<vmem>>, vector<1x1xf32>
      %187 = vector.broadcast %186 : vector<1x1xf32> to vector<8x1xf32>
      %188 = arith.addf %185, %187 : vector<8x1xf32>
      %c0_80 = arith.constant 0 : index
      %c0_81 = arith.constant 0 : index
      %c0_82 = arith.constant 0 : index
      %189 = vector.load %arg27[%c0_80, %c0_81, %c0_82] : memref<1x8x1xf32, #tpu.memory_space<vmem>>, vector<1x8x1xf32>
      %190 = vector.shape_cast %189 : vector<1x8x1xf32> to vector<8x1xf32>
      %191 = vector.shape_cast %188 : vector<8x1xf32> to vector<1x8x1xf32>
      tpu.vector_store %arg27[%c0_80, %c0_81, %c0_82], %191 {strides = array<i32>} : memref<1x8x1xf32, #tpu.memory_space<vmem>>, vector<1x8x1xf32>,
    } else {
    }
    return
  }
  func.func @transform_0(%arg0: i32, %arg1: i32) -> (i32, i32) {
    %c0_i32 = arith.constant 0 : i32
    %c0_i32_0 = arith.constant 0 : i32
    %c0_i32_1 = arith.constant 0 : i32
    return %c0_i32, %c0_i32_0 : i32, i32
  }
  func.func @transform_1(%arg0: i32, %arg1: i32) -> (i32, i32, i32) {
    %c0_i32 = arith.constant 0 : i32
    %c0_i32_0 = arith.constant 0 : i32
    %c0_i32_1 = arith.constant 0 : i32
    return %arg0, %c0_i32, %c0_i32_0 : i32, i32, i32
  }
  func.func @transform_2(%arg0: i32, %arg1: i32) -> (i32, i32) {
    %c0_i32 = arith.constant 0 : i32
    %c0_i32_0 = arith.constant 0 : i32
    %c0_i32_1 = arith.constant 0 : i32
    return %c0_i32, %c0_i32_0 : i32, i32
  }
  func.func @transform_3(%arg0: i32, %arg1: i32) -> (i32, i32) {
    %c0_i32 = arith.constant 0 : i32
    %c0_i32_0 = arith.constant 0 : i32
    %c0_i32_1 = arith.constant 0 : i32
    return %c0_i32, %c0_i32_0 : i32, i32
  }
  func.func @transform_4(%arg0: i32, %arg1: i32) -> (i32, i32) {
    %c0_i32 = arith.constant 0 : i32
    %c0_i32_0 = arith.constant 0 : i32
    %c0_i32_1 = arith.constant 0 : i32
    return %c0_i32, %c0_i32_0 : i32, i32
  }
  func.func @transform_5(%arg0: i32, %arg1: i32) -> (i32, i32) {
    %c0_i32 = arith.constant 0 : i32
    %c0_i32_0 = arith.constant 0 : i32
    %c0_i32_1 = arith.constant 0 : i32
    return %c0_i32, %c0_i32_0 : i32, i32
  }
  func.func @transform_6(%arg0: i32, %arg1: i32) -> (i32, i32) {
    %c0_i32 = arith.constant 0 : i32
    %c0_i32_0 = arith.constant 0 : i32
    %c0_i32_1 = arith.constant 0 : i32
    return %c0_i32, %c0_i32_0 : i32, i32
  }
  func.func @transform_7(%arg0: i32, %arg1: i32) -> (i32, i32) {
    %c0_i32 = arith.constant 0 : i32
    %c0_i32_0 = arith.constant 0 : i32
    %c0_i32_1 = arith.constant 0 : i32
    return %c0_i32, %c0_i32_0 : i32, i32
  }
  func.func @transform_8(%arg0: i32, %arg1: i32) -> (i32, i32) {
    %c0_i32 = arith.constant 0 : i32
    %c0_i32_0 = arith.constant 0 : i32
    %c0_i32_1 = arith.constant 0 : i32
    return %c0_i32, %c0_i32_0 : i32, i32
  }
  func.func @transform_9(%arg0: i32, %arg1: i32) -> (i32, i32) {
    %c0_i32 = arith.constant 0 : i32
    %c0_i32_0 = arith.constant 0 : i32
    %c0_i32_1 = arith.constant 0 : i32
    return %c0_i32, %c0_i32_0 : i32, i32
  }
  func.func @transform_10(%arg0: i32, %arg1: i32) -> (i32, i32) {
    %c0_i32 = arith.constant 0 : i32
    %c0_i32_0 = arith.constant 0 : i32
    %c0_i32_1 = arith.constant 0 : i32
    return %c0_i32, %c0_i32_0 : i32, i32
  }
  func.func @transform_11(%arg0: i32, %arg1: i32) -> (i32, i32, i32) {
    %c0_i32 = arith.constant 0 : i32
    %c0_i32_0 = arith.constant 0 : i32
    %c0_i32_1 = arith.constant 0 : i32
    return %arg1, %c0_i32, %c0_i32_0 : i32, i32, i32
  }
  func.func @transform_12(%arg0: i32, %arg1: i32) -> (i32, i32, i32) {
    %c0_i32 = arith.constant 0 : i32
    %c0_i32_0 = arith.constant 0 : i32
    %c0_i32_1 = arith.constant 0 : i32
    return %arg1, %c0_i32, %c0_i32_0 : i32, i32, i32
  }
  func.func @transform_13(%arg0: i32, %arg1: i32) -> (i32, i32, i32) {
    %c0_i32 = arith.constant 0 : i32
    %c0_i32_0 = arith.constant 0 : i32
    %c0_i32_1 = arith.constant 0 : i32
    return %arg1, %c0_i32, %c0_i32_0 : i32, i32, i32
  }
  func.func @transform_14(%arg0: i32, %arg1: i32) -> (i32, i32, i32) {
    %c0_i32 = arith.constant 0 : i32
    %c0_i32_0 = arith.constant 0 : i32
    %c0_i32_1 = arith.constant 0 : i32
    return %arg1, %c0_i32, %c0_i32_0 : i32, i32, i32
  }
  func.func @transform_15(%arg0: i32, %arg1: i32) -> (i32, i32, i32) {
    %c0_i32 = arith.constant 0 : i32
    %c0_i32_0 = arith.constant 0 : i32
    %c0_i32_1 = arith.constant 0 : i32
    return %arg1, %c0_i32, %c0_i32_0 : i32, i32, i32
  }
  func.func @transform_16(%arg0: i32, %arg1: i32) -> (i32, i32, i32) {
    %c0_i32 = arith.constant 0 : i32
    %c0_i32_0 = arith.constant 0 : i32
    %c0_i32_1 = arith.constant 0 : i32
    return %arg1, %c0_i32, %c0_i32_0 : i32, i32, i32
  }
  func.func @transform_17(%arg0: i32, %arg1: i32) -> (i32, i32, i32) {
    %c0_i32 = arith.constant 0 : i32
    %c0_i32_0 = arith.constant 0 : i32
    %c0_i32_1 = arith.constant 0 : i32
    return %arg1, %c0_i32, %c0_i32_0 : i32, i32, i32
  }
  func.func @transform_18(%arg0: i32, %arg1: i32) -> (i32, i32, i32) {
    %c0_i32 = arith.constant 0 : i32
    %c0_i32_0 = arith.constant 0 : i32
    %c0_i32_1 = arith.constant 0 : i32
    return %arg1, %c0_i32, %c0_i32_0 : i32, i32, i32
  }
  func.func @transform_19(%arg0: i32, %arg1: i32) -> (i32, i32, i32) {
    %c0_i32 = arith.constant 0 : i32
    %c0_i32_0 = arith.constant 0 : i32
    %c0_i32_1 = arith.constant 0 : i32
    return %arg1, %c0_i32, %c0_i32_0 : i32, i32, i32
  }
  func.func @transform_20(%arg0: i32, %arg1: i32) -> (i32, i32, i32) {
    %c0_i32 = arith.constant 0 : i32
    %c0_i32_0 = arith.constant 0 : i32
    %c0_i32_1 = arith.constant 0 : i32
    return %arg1, %c0_i32, %c0_i32_0 : i32, i32, i32
  }
  func.func @transform_21(%arg0: i32, %arg1: i32) -> (i32, i32, i32) {
    %c0_i32 = arith.constant 0 : i32
    %c0_i32_0 = arith.constant 0 : i32
    %c0_i32_1 = arith.constant 0 : i32
    return %arg1, %c0_i32, %c0_i32_0 : i32, i32, i32
  }
  func.func @transform_22(%arg0: i32, %arg1: i32) -> (i32, i32, i32) {
    %c0_i32 = arith.constant 0 : i32
    %c0_i32_0 = arith.constant 0 : i32
    %c0_i32_1 = arith.constant 0 : i32
    return %arg1, %c0_i32, %c0_i32_0 : i32, i32, i32
  }
  func.func @transform_23(%arg0: i32, %arg1: i32) -> (i32, i32) {
    %c0_i32 = arith.constant 0 : i32
    %c0_i32_0 = arith.constant 0 : i32
    %c0_i32_1 = arith.constant 0 : i32
    return %c0_i32, %c0_i32_0 : i32, i32
  }
  func.func @transform_24(%arg0: i32, %arg1: i32) -> (i32, i32) {
    %c0_i32 = arith.constant 0 : i32
    %c0_i32_0 = arith.constant 0 : i32
    %c0_i32_1 = arith.constant 0 : i32
    return %c0_i32, %c0_i32_0 : i32, i32
  }
  func.func @transform_25(%arg0: i32, %arg1: i32) -> (i32, i32, i32) {
    %c0_i32 = arith.constant 0 : i32
    %c0_i32_0 = arith.constant 0 : i32
    %c0_i32_1 = arith.constant 0 : i32
    return %arg0, %c0_i32, %c0_i32_0 : i32, i32, i32
  }
}

</mosaic_0001>

<bundles_post_ra>
// kernel: tpu_custom_call.1
= control target key start
LH: loop header
LB: loop body
LE: loop exit
PB: predicated region body
PF: predicated region fallthrough
CT: control target
= control target key end

     0   :  { %s5573_s26 = smov 0   ;;  %s5579_s27 = smov 0   ;;  %s6203_s0 = inlined_call_operand.<no memory space> [shape: f32[1,1], index: 0, kind: input, shape index: {}]   ;;  %s6204_s1 = inlined_call_operand.vmem [shape: f32[2,8,2], index: 1, kind: input, shape index: {}]   ;;  %s6205_s2 = inlined_call_operand.vmem [shape: f32[1,16], index: 2, kind: input, shape index: {}]   ;;  %s6206_s3 = inlined_call_operand.vmem [shape: f32[2,32], index: 3, kind: input, shape index: {}]   ;;  %s6207_s4 = inlined_call_operand.vmem [shape: f32[1,32], index: 4, kind: input, shape index: {}]   ;;  %s6208_s5 = inlined_call_operand.vmem [shape: f32[32,32], index: 5, kind: input, shape index: {}]   ;;  %s6209_s6 = inlined_call_operand.vmem [shape: f32[1,32], index: 6, kind: input, shape index: {}]   ;;  %s6210_s7 = inlined_call_operand.vmem [shape: f32[32,32], index: 7, kind: input, shape index: {}]   ;;  %s6211_s8 = inlined_call_operand.vmem [shape: f32[1,32], index: 8, kind: input, shape index: {}]   ;;  %s6212_s9 = inlined_call_operand.vmem [shape: f32[32,32], index: 9, kind: input, shape index: {}]   ;;  %s6213_s10 = inlined_call_operand.vmem [shape: f32[1,32], index: 10, kind: input, shape index: {}]   ;;  %s6214_s11 = inlined_call_operand.vmem [shape: bf16[2,32,96], index: 11, kind: input, shape index: {}]   ;;  %s6215_s12 = inlined_call_operand.vmem [shape: f32[2,1,96], index: 12, kind: input, shape index: {}]   ;;  %s6216_s13 = inlined_call_operand.vmem [shape: bf16[2,32,32], index: 13, kind: input, shape index: {}]   ;;  %s6217_s14 = inlined_call_operand.vmem [shape: f32[2,1,32], index: 14, kind: input, shape index: {}]   ;;  %s6218_s15 = inlined_call_operand.vmem [shape: f32[2,1,32], index: 15, kind: input, shape index: {}]   ;;  %s6219_s16 = inlined_call_operand.vmem [shape: f32[2,1,32], index: 16, kind: input, shape index: {}]   ;;  %s6220_s17 = inlined_call_operand.vmem [shape: bf16[2,32,2048], index: 17, kind: input, shape index: {}]   ;;  %s6221_s18 = inlined_call_operand.vmem [shape: f32[2,1,2048], index: 18, kind: input, shape index: {}]   ;;  %s6222_s19 = inlined_call_operand.vmem [shape: bf16[2,2048,32], index: 19, kind: input, shape index: {}]   ;;  %s6223_s20 = inlined_call_operand.vmem [shape: f32[2,1,32], index: 20, kind: input, shape index: {}]   ;;  %s6224_s21 = inlined_call_operand.vmem [shape: f32[2,1,32], index: 21, kind: input, shape index: {}]   ;;  %s6225_s22 = inlined_call_operand.vmem [shape: f32[2,1,32], index: 22, kind: input, shape index: {}]   ;;  %s6226_s23 = inlined_call_operand.vmem [shape: f32[1,32], index: 23, kind: input, shape index: {}]   ;;  %s6227_s25 = inlined_call_operand.vmem [shape: f32[2,8,1], index: 25, kind: output, shape index: {}]   ;;  %s6228_s24 = inlined_call_operand.<no memory space> [shape: f32[1,1], index: 24, kind: input, shape index: {}]  }
   0x1   :  { %6238 = sst [smem:[#allocation12_spill]] %s6203_s0  ;;  %v32_v1 = vstv %s6228_s24 }
   0x2   :  { %6239 = sst [smem:[#allocation13_spill]] %s6204_s1  ;;  %33 = vst [vmem:[#allocation4] sm:$0x1] %v32_v1  ;;  %s5575_s1 = smov 0  }
   0x3   :  { %6240 = sst [smem:[#allocation14_spill]] %s6205_s2 }
   0x4   :  { %6241 = sst [smem:[#allocation15_spill]] %s6206_s3  ;;  %s5571_s3 = smov 0  }
   0x5   :  { %6242 = sst [smem:[#allocation16_spill]] %s6207_s4 }
   0x6   :  { %6243 = sst [smem:[#allocation17_spill]] %s6208_s5 }
   0x7   :  { %6244 = sst [smem:[#allocation18_spill]] %s6209_s6 }
   0x8   :  { %6245 = sst [smem:[#allocation19_spill]] %s6210_s7 }
   0x9   :  { %6246 = sst [smem:[#allocation20_spill]] %s6211_s8  ;;  %s5577_s8 = smov 0  }
   0xa   :  { %6247 = sst [smem:[#allocation21_spill]] %s6212_s9 }
   0xb   :  { %6248 = sst [smem:[#allocation22_spill]] %s6213_s10 }
   0xc   :  { %6249 = sst [smem:[#allocation23_spill]] %s6214_s11 }
   0xd   :  { %6250 = sst [smem:[#allocation24_spill]] %s6216_s13 }
   0xe   :  { %6251 = sst [smem:[#allocation25_spill]] %s6220_s17 }
   0xf   :  { %6252 = sst [smem:[#allocation26_spill]] %s6221_s18 }
  0x10   :  { %6253 = sst [smem:[#allocation27_spill]] %s6226_s23 }
  0x11   :  { %6254 = sst [smem:[#allocation28_spill]] %s6227_s25 }
  0x12   :  { %s6255_s6 = sld [smem:[#allocation12_spill]] }
  0x18   :  { %v30_v0 = vstv %s6255_s6 }
  0x19   :  { %31 = vst [vmem:[#allocation3] sm:$0x1] %v30_v0 }
  0x1a LB: > { %6256 = sst [smem:[#allocation5_spill]] %s5394_s3  ;;  %s48_s24 = sadd.s32 1, %s5402_s1  ;;  %s5410_s27 = sphi %s5579_s27, %s39_s27   ;;  %s5406_s8 = sphi %s5577_s8, %s6292_s8   ;;  %s5402_s1 = sphi %s5575_s1, %s6291_s1   ;;  %s5398_s26 = sphi %s5573_s26, %s6290_s26   ;;  %s5394_s3 = sphi %s5571_s3, %s6289_s3  }
  0x1b   : > { %6257 = sst [smem:[#allocation6_spill]] %s5402_s1  ;;  %s51_s4 = sadd.s32 1, %s5406_s8 }
  0x1c   : > { %6258 = sst [smem:[#allocation7_spill]] %s5406_s8  ;;  %p49_p0 = scmp.ge.s32.totalorder %s48_s24, 2 }
  0x1d   : > { %6259 = sst [smem:[#allocation8_spill]] %s5410_s27  ;;  %p4392_p1 = scmp.ge.s32.totalorder %s5410_s27, 1 }
  0x1e   : > { %p807_p2 = scmp.lt.s32.totalorder %s5410_s27, 5  ;;  %s6294_s24 = smov (%p49_p0, %s48_s24), 0 }
  0x1f   : > { %6260 = sst [smem:[#allocation9_spill]] %s6294_s24  ;;  %s6296_s4 = smov (!%p49_p0, %s51_s4), %s5406_s8 }
  0x20   : > { %p808_p3 = pnand %p4392_p1, %p807_p2  ;;  %p53_p4 = scmp.ge.s32.totalorder %s6296_s4, 2 }
  0x22   : > { %s6298_s4 = smov (%p53_p4, %s6296_s4), 0  ;;  %811 = sbr.rel (%p808_p3) target bundleno = 2900 (0xb54), region = 120 }
  0x23   : > { %6261 = sst [smem:[#allocation10_spill]] %s6298_s4 }
  0x27   : > { %p918_p5 = scmp.lt.s32.totalorder %s5398_s26, 1  ;;  %p922_p6 = scmp.lt.s32.totalorder %s5394_s3, 1 }
  0x28   : > { %s6262_s29 = sld [smem:[#allocation13_spill]] }
  0x29   : > { %s6300_s26 = smov (!%p918_p5, %s5398_s26), 1  ;;  %s6263_s11 = sld [smem:[#allocation23_spill]] }
  0x2a   : > { %s5605_s28 = scalar_select %p922_p6, %s5394_s3, 1 }
  0x2b   : > { %s4393_s9 = sshll.u32 %s6300_s26, 3  ;;  %s6265_s13 = sld [smem:[#allocation24_spill]] }
  0x2c   : > { %s5096_s6 = sshll.u32 %s5605_s28, 4  ;;  %s6266_s18 = sld [smem:[#allocation26_spill]] }
  0x2d   : > { %s6267_s17 = sld [smem:[#allocation25_spill]]  ;;  %s5099_s3 = sshll.u32 %s5605_s28, 10 }
  0x2e   : > { %s921_s2 = scalar_lea.vmem %s6262_s29, %s4393_s9  ;;  %s5652_s0 = scalar_lea.vmem %s6222_s19, %s5099_s3 }
  0x2f   : > { %s5614_s4 = scalar_lea.vmem %s6263_s11, %s5096_s6  ;;  %s960_s7 = scalar_lea.vmem %s6223_s20, %s5605_s28 }
  0x30   : > { %6264 = sst [smem:[#allocation11_spill]] %s5614_s4  ;;  %s5098_s4 = sshll.u32 %s5605_s28, 8 }
  0x31   : > { %s5623_s10 = scalar_lea.vmem %s6265_s13, %s5096_s6  ;;  %s966_s23 = scalar_lea.vmem %s6225_s22, %s5605_s28 }
  0x32   : > { %s5641_s1 = scalar_lea.vmem %s6266_s18, %s5096_s6  ;;  %s963_s6 = scalar_lea.vmem %s6224_s21, %s5605_s28 }
  0x33   : > { %s5646_s13 = scalar_lea.vmem %s6267_s17, %s5098_s4  ;;  %s6268_s17 = sld [smem:[#allocation28_spill]] }
  0x34   : > { %s6269_s5 = sld [smem:[#allocation5_spill]] }
  0x39   : > { %s5669_s18 = scalar_lea.vmem %s6268_s17, %s4393_s9 }
  0x3a   : > { %p4404_p7 = scmp.ne.s32.totalorder %s6269_s5, 0 }
  0x3b   : > { %s6270_s3 = sld [smem:[#allocation14_spill]] (!%p4404_p7) }
  0x3c   : > { %975 = sbr.rel (%p4404_p7) target bundleno = 818 (0x332), region = 124  ;;  %s6274_s11 = sld [smem:[#allocation19_spill]] (!%p4404_p7) }
  0x3d   : > { %s6275_s24 = sld [smem:[#allocation18_spill]] (!%p4404_p7) }
  0x3e   : > { %s6276_s5 = sld [smem:[#allocation20_spill]] (!%p4404_p7) }
  0x3f   : > { %s6277_s17 = sld [smem:[#allocation21_spill]] (!%p4404_p7) }
  0x40   : > { %s6279_s9 = sld [smem:[#allocation15_spill]] (!%p4404_p7) }
  0x41   : > { %v976_v2 = vld [vmem:[#allocation3] sm:$0x1]  ;;  %v2052_v3 = vld [vmem:[%s921_s2] sm:$0xff]  ;;  %v5412_v4 = vmov 0   ;;  %v5413_v5 = vmov 1   ;;  %s6271_s2 = sld [smem:[#allocation17_spill]] }
  0x42   : > { %5327 = vset.pattern.permute.xlu0 %v5412_v4  ;;  %5328 = vset.pattern.permute.xlu1 %v5413_v5  ;;  %v977_v6 = vld [vmem:[%s6270_s3] sm:$0x1]  ;;  %v5414_v21 = vmov 683565275   ;;  %v5415_v23 = vmov 2475754826  }
  0x43   : > { %980 = vperm.xlu0 %5327, %v976_v2   ;;  %2063 = vperm.xlu1 %5328, %v2052_v3   ;;  %v5416_v26 = vmov 2131351028   ;;  %v5417_v29 = vmov 2102212464   ;;  %v5418_v32 = vmov 920167782  }
  0x44   : > { %v5419_v35 = vmov 1326507024  }
  0x4b   : > { %2056 = vperm.xlu0 %5327, %v2052_v3  }
  0x53   : > { %5329 = vset.pattern.permute.xlu0 %v5413_v5 }
  0xb5   : > { %v981_v7 = vpop.permute.xlu0 %980 }
  0xb6   : > { %v983_v8 = vperm.slane %v981_v7, 0 }
  0xb8   : > { %v5676_v9 = vmul.f32 %v983_v8, %v977_v6 }
  0xba   : > { %v988_v10 = vand.u32 2139095040, %v5676_v9  ;;  %v985_v13 = vand.u32 2147483647, %v5676_v9  ;;  %vm987_vm12 = vcmp.lt.s32.totalorder %v5676_v9, 0 }
  0xbc   : > { %v989_v11 = vshrl.u32 %v988_v10, 23  ;;  %v992_v15 = vand.u32 8388607, %v985_v13  ;;  %vm5762_vm13 = vcmp.le.f32.partialorder %v985_v13, 0.7853982 }
  0xbe   : > { %v4405_v12 = vadd.s32 4294967169, %v989_v11  ;;  %v993_v19 = vor.u32 8388608, %v992_v15 }
  0xc0   : > { %v995_v14 = vadd.s32 1, %v4405_v12  ;;  %v5693_v42 = vshll.u32 %v993_v19, 8 }
  0xc2   : > { %vm996_vm0 = vcmp.gt.s32.totalorder %v995_v14, 0  ;;  %v1034_v51 = vand.u32 65535, %v5693_v42  ;;  %v1035_v52 = vshrl.u32 %v5693_v42, 16 }
  0xc3   : > { %v997_v16 = vsel %vm996_vm0, %v995_v14, 0 }
  0xc4   : > { %v999_v17 = vand.u32 31, %v997_v16  ;;  %v5684_v20 = vshrl.u32 %v997_v16, 5 }
  0xc6   : > { %v5682_v18 = vsub.s32 32, %v999_v17  ;;  %v1002_v22 = vshll.u32 %v5414_v21, %v999_v17  ;;  %v1005_v24 = vshll.u32 %v5415_v23, %v999_v17  ;;  %v1008_v28 = vshll.u32 %v5416_v26, %v999_v17 }
  0xc7   : > { %v1011_v31 = vshll.u32 %v5417_v29, %v999_v17  ;;  %v1014_v34 = vshll.u32 %v5418_v32, %v999_v17  ;;  %vm1017_vm1 = vcmp.lt.s32.totalorder %v5684_v20, 1  ;;  %vm1020_vm2 = vcmp.lt.s32.totalorder %v5684_v20, 4 }
  0xc8   : > { %v1003_v25 = vshrl.u32 %v5415_v23, %v5682_v18  ;;  %v1006_v27 = vshrl.u32 %v5416_v26, %v5682_v18  ;;  %v1009_v30 = vshrl.u32 %v5417_v29, %v5682_v18  ;;  %v1012_v33 = vshrl.u32 %v5418_v32, %v5682_v18 }
  0xc9   : > { %v1015_v36 = vshrl.u32 %v5419_v35, %v5682_v18  ;;  %vm1019_vm3 = vcmp.lt.s32.totalorder %v5684_v20, 3  ;;  %vm1018_vm4 = vcmp.lt.s32.totalorder %v5684_v20, 2  ;;  %v1001_v16 = vshrl.u32 %v5414_v21, %v5682_v18  ;;  %v1297_v20 = vld [vmem:[%s6271_s2 + $0x18] sm:$0xff] }
  0xca   : > { %v1004_v37 = vor.u32 %v1003_v25, %v1002_v22  ;;  %v1007_v38 = vor.u32 %v1006_v27, %v1005_v24  ;;  %v1010_v39 = vor.u32 %v1009_v30, %v1008_v28  ;;  %v1013_v40 = vor.u32 %v1012_v33, %v1011_v31 }
  0xcb   : > { %v1016_v41 = vor.u32 %v1015_v36, %v1014_v34 }
  0xcc   : > { %v1025_v43 = vsel %vm1017_vm1, %v1004_v37, %v1007_v38  ;;  %v1029_v44 = vsel %vm1017_vm1, %v1007_v38, %v1010_v39  ;;  %v1026_v45 = vsel %vm1020_vm2, %v1013_v40, 920167782  ;;  %v1022_v12 = vsel %vm1020_vm2, %v1010_v39, 2102212464 }
  0xcd   : > { %v1030_v46 = vsel %vm1020_vm2, %v1016_v41, 1326507024  ;;  %v1027_v47 = vsel %vm1019_vm3, %v1010_v39, %v1026_v45  ;;  %v1021_v25 = vsel %vm1017_vm1, %v1001_v16, %v1004_v37  ;;  %v1023_v26 = vsel %vm1019_vm3, %v1007_v38, %v1022_v12 }
  0xce   : > { %v1031_v48 = vsel %vm1019_vm3, %v1013_v40, %v1030_v46  ;;  %v1028_v49 = vsel %vm1018_vm4, %v1025_v43, %v1027_v47  ;;  %v1024_v18 = vsel %vm1018_vm4, %v1021_v25, %v1023_v26  ;;  %v1316_v45 = vand.u32 4294901760, %v1297_v20 }
  0xcf   : > { %v1032_v50 = vsel %vm1018_vm4, %v1029_v44, %v1031_v48  ;;  %v1058_v55 = vand.u32 65535, %v1028_v49  ;;  %v1059_v56 = vshrl.u32 %v1028_v49, 16  ;;  %v1078_v33 = vmul.u32 %v5693_v42, %v1024_v18  ;;  %v1296_v42 = vld [vmem:[%s6271_s2 + $0x10] sm:$0xff] }
  0xd0   : > { %v1036_v53 = vand.u32 65535, %v1032_v50  ;;  %v1037_v54 = vshrl.u32 %v1032_v50, 16  ;;  %v1344_v46 = vsub.f32 %v1297_v20, %v1316_v45  ;;  %v1318_v47 = vand.u32 4294901760, %v1296_v42  ;;  %1401 = vmatpush.msra.mxu3 %v1316_v45  ;;  %1317 = vmatpush.msra.mxu0 %v1316_v45 }
  0xd1   : > { %v1061_v59 = vmul.u32 %v1059_v56, %v1034_v51  ;;  %v1062_v60 = vmul.u32 %v1058_v55, %v1035_v52  ;;  %v1060_v0 = vmul.u32 %v1058_v55, %v1034_v51  ;;  %v1063_v5 = vmul.u32 %v1059_v56, %v1035_v52 }
  0xd2   : > { %v1039_v57 = vmul.u32 %v1037_v54, %v1034_v51  ;;  %v1040_v58 = vmul.u32 %v1036_v53, %v1035_v52  ;;  %v1038_v61 = vmul.u32 %v1036_v53, %v1034_v51  ;;  %v1041_v63 = vmul.u32 %v1037_v54, %v1035_v52  ;;  %1376 = vmatpush.msra.mxu2 %v1344_v46 }
  0xd3   : > { %v1064_v1 = vshll.u32 %v1061_v59, 16  ;;  %v1066_v7 = vshll.u32 %v1062_v60, 16  ;;  %v1065_v23 = vshrl.u32 %v1061_v59, 16  ;;  %v1067_v29 = vshrl.u32 %v1062_v60, 16  ;;  %1403 = vmatpush.msra.mxu3 %v1318_v47  ;;  %1319 = vmatpush.msra.mxu0 %v1318_v47 }
  0xd4   : > { %v1042_v62 = vshll.u32 %v1039_v57, 16  ;;  %v1044_v2 = vshll.u32 %v1040_v58, 16  ;;  %v1043_v17 = vshrl.u32 %v1039_v57, 16  ;;  %v1045_v27 = vshrl.u32 %v1040_v58, 16 }
  0xd5   : > { %vm1068_vm6 = vc.u32 %v1060_v0, %v1064_v1  ;;  %v1070_v8 = vadd.s32 %v1064_v1, %v1060_v0  ;;  %v1345_v52 = vand.u32 4294901760, %v1344_v46  ;;  %v1350_v53 = vsub.f32 %v1296_v42, %v1318_v47  ;;  %v1295_v1 = vld [vmem:[%s6271_s2 + $0x8] sm:$0xff] }
  0xd6   : > { %vm1046_vm5 = vc.u32 %v1038_v61, %v1042_v62  ;;  %v1048_v3 = vadd.s32 %v1042_v62, %v1038_v61  ;;  %v1069_v11 = vsel %vm1068_vm6, 1, %v5412_v4  ;;  %vm1298_vm1 = vcmask 130048  }
  0xd7   : > { %v1047_v6 = vsel %vm1046_vm5, 1, %v5412_v4  ;;  %v1071_v15 = vadd.s32 %v1069_v11, %v1063_v5  ;;  %vm1072_vm8 = vc.u32 %v1070_v8, %v1066_v7  ;;  %v1074_v32 = vadd.s32 %v1070_v8, %v1066_v7  ;;  %1428 = vmatpush.msrb.mxu0 %v1345_v52  ;;  %1379 = vmatpush.msra.mxu2 %v1350_v53 }
  0xd8   : > { %v1049_v10 = vadd.s32 %v1047_v6, %v1041_v63  ;;  %vm1050_vm7 = vc.u32 %v1048_v3, %v1044_v2  ;;  %v1073_v22 = vsel %vm1072_vm8, 1, %v5412_v4  ;;  %v1346_v57 = vsub.f32 %v1344_v46, %v1345_v52  ;;  %v1294_v6 = vld [vmem:[%s6271_s2] sm:$0xff] }
  0xd9   : > { %v1051_v14 = vsel %vm1050_vm7, 1, %v5412_v4  ;;  %v1075_v24 = vadd.s32 %v1073_v22, %v1071_v15  ;;  %v1351_v58 = vand.u32 4294901760, %v1350_v53  ;;  %v5743_v5 = vand.u32 4294901760, %v1295_v1  ;;  %v1648_v15 = vld [vmem:[%s6274_s11 + $0x18] sm:$0xff] }
  0xda   : > { %v1053_v19 = vadd.s32 %v1051_v14, %v1049_v10  ;;  %v1347_v61 = vand.u32 4294901760, %v1346_v57  ;;  %v5752_v10 = vand.u32 4294901760, %v1294_v6  ;;  %vm1128_vm5 = vweird.f32 %v5676_v9 }
  0xdb   : > { %v1076_v30 = vadd.s32 %v1075_v24, %v1065_v23  ;;  %v1352_v62 = vsub.f32 %v1350_v53, %v1351_v58  ;;  %1432 = vmatpush.msrb.mxu0 %v1351_v58  ;;  %1479 = vmatpush.msrb.mxu2 %v5743_v5  ;;  %v5750_v8 = vsub.f32 %v1295_v1, %v5743_v5 }
  0xdc   : > { %v1054_v28 = vadd.s32 %v1053_v19, %v1043_v17  ;;  %1348 = vmatpush.msra.mxu1 %v1347_v61  ;;  %v5758_v14 = vsub.f32 %v1294_v6, %v5752_v10 }
  0xdd   : > { %v1077_v21 = vadd.s32 %v1076_v30, %v1067_v29  ;;  %v1353_v0 = vand.u32 4294901760, %v1352_v62  ;;  %v1507_v12 = vand.u32 4294901760, %v5750_v8  ;;  %1481 = vmatpush.msrb.mxu2 %v5752_v10 }
  0xde   : > { %v1055_v31 = vadd.s32 %v1054_v28, %v1045_v27  ;;  %v1513_v23 = vand.u32 4294901760, %v5758_v14 }
  0xdf   : > { %v1081_v4 = vadd.s32 1, %v1077_v21  ;;  %1354 = vmatpush.msra.mxu1 %v1353_v0  ;;  %v1508_v17 = vsub.f32 %v5750_v8, %v1507_v12 }
  0xe0   : > { %vm1080_vm9 = vc.u32 %v1055_v31, %v1074_v32  ;;  %v1079_v49 = vadd.s32 %v1074_v32, %v1055_v31  ;;  %v1514_v26 = vsub.f32 %v5758_v14, %v1513_v23 }
  0xe1   : > { %v1082_v34 = vsel %vm1080_vm9, %v1081_v4, %v1077_v21  ;;  %1453 = vmatpush.msrb.mxu1 %v1316_v45  ;;  %v1509_v25 = vand.u32 4294901760, %v1508_v17  ;;  %v1666_v17 = vand.u32 4294901760, %v1648_v15 }
  0xe2   : > { %v1083_v35 = vadd.s32 %v1082_v34, %v1078_v33  ;;  %v1515_v29 = vand.u32 4294901760, %v1514_v26 }
  0xe3   : > { %1455 = vmatpush.msrb.mxu1 %v1318_v47  ;;  %1510 = vmatpush.msrb.mxu3 %v1509_v25 }
  0xe4   : > { %v1084_v36 = vadd.s32 536870912, %v1083_v35 }
  0xe5   : > { %1516 = vmatpush.msrb.mxu3 %v1515_v29 }
  0xe6   : > { %v5731_v37 = vshrl.u32 %v1084_v36, 30 }
  0xe8   : > { %v1086_v38 = vshll.u32 %v5731_v37, 30  ;;  %v1109_v19 = vsub.s32 4, %v5731_v37 }
  0xea   : > { %v1087_v39 = vsub.s32 %v1083_v35, %v1086_v38  ;;  %v1110_v28 = vsel %vm987_vm12, %v1109_v19, %v5731_v37 }
  0xeb   : > { %v1112_v32 = vsel %vm5762_vm13, 0, %v1110_v28 }
  0xec   : > { %vm1088_vm10 = vcmp.lt.s32.totalorder %v1087_v39, 0  ;;  %v1089_v40 = vsub.s32 0, %v1087_v39  ;;  %v1129_v34 = vadd.s32 3, %v1112_v32 }
  0xee   : > { %v1090_v41 = vsel %vm1088_vm10, %v1089_v40, %v1087_v39  ;;  %v1284_v40 = vand.u32 3, %v1112_v32  ;;  %v1645_v32 = vld [vmem:[%s6274_s11] sm:$0xff]  ;;  %vm1650_vm10 = vcmask 261120  }
  0xef   : > { %v1091_v43 = vclz %v1090_v41  ;;  %v1130_v41 = vand.u32 3, %v1129_v34 }
  0xf0   : > { %vm1285_vm14 = vcmp.lt.s32.totalorder %v1284_v40, 2  ;;  %vm1286_vm15 = vcmp.eq.s32.totalorder %v1284_v40, 0  ;;  %vm1289_vm0 = vcmp.eq.s32.totalorder %v1284_v40, 2 }
  0xf1   : > { %v4406_v44 = vadd.s32 4294967294, %v1091_v43  ;;  %vm1131_vm2 = vcmp.lt.s32.totalorder %v1130_v41, 2  ;;  %vm1132_vm3 = vcmp.eq.s32.totalorder %v1130_v41, 0  ;;  %vm1135_vm4 = vcmp.eq.s32.totalorder %v1130_v41, 2 }
  0xf3   : > { %vm4407_vm11 = vcmp.lt.s32.totalorder %v4406_v44, 0 }
  0xf4   : > { %v1094_v48 = vsel %vm4407_vm11, 0, %v4406_v44 }
  0xf5   : > { %v1095_v50 = vsub.s32 32, %v1094_v48  ;;  %v1099_v51 = vsub.s32 4294967266, %v1094_v48  ;;  %v1096_v54 = vshll.u32 %v1087_v39, %v1094_v48 }
  0xf7   : > { %v1097_v55 = vshrl.u32 %v1079_v49, %v1095_v50  ;;  %v1100_v56 = vadd.s32 127, %v1099_v51 }
  0xf9   : > { %v1098_v59 = vor.u32 %v1097_v55, %v1096_v54  ;;  %v1101_v60 = vshll.u32 %v1100_v56, 23 }
  0xfb   : > { %v1102_v63 = vor.u32 4788187, %v1101_v60  ;;  %v1105_v3 = vcvt.s32.f32 %v1098_v59 }
  0xfd   : > { %v1103_v2 = vand.u32 2147483647, %v1102_v63 }
  0xff   : > { %v1106_v7 = vmul.f32 %v1105_v3, %v1103_v2 }
 0x101   : > { %v1107_v11 = vxor.u32 2147483648, %v1106_v7 }
 0x103   : > { %v1108_v16 = vsel %vm987_vm12, %v1107_v11, %v1106_v7 }
 0x104   : > { %v1111_v22 = vsel %vm5762_vm13, %v5676_v9, %v1108_v16 }
 0x105   : > { %v1113_v24 = vmul.f32 %v1111_v22, %v1111_v22 }
 0x107   : > { %v1121_v27 = vmul.f32 -0.00019511016, %v1113_v24  ;;  %v1114_v13 = vmul.f32 -0.001358992, %v1113_v24 }
 0x109   : > { %v1122_v30 = vadd.f32 0.008332121, %v1121_v27  ;;  %v1115_v31 = vadd.f32 0.041655596, %v1114_v13  ;;  %v1646_v27 = vld [vmem:[%s6274_s11 + $0x8] sm:$0xff] }
 0x10b   : > { %v1123_v18 = vmul.f32 %v1122_v30, %v1113_v24  ;;  %v1116_v21 = vmul.f32 %v1115_v31, %v1113_v24  ;;  %v1670_v30 = vand.u32 4294901760, %v1646_v27 }
 0x10d   : > { %v1124_v4 = vadd.f32 -0.16666654, %v1123_v18  ;;  %v1117_v33 = vadd.f32 -0.4999988, %v1116_v21 }
 0x10f   : > { %v1125_v35 = vmul.f32 %v1124_v4, %v1113_v24  ;;  %v1118_v36 = vmul.f32 %v1117_v33, %v1113_v24  ;;  %v1696_v24 = vsub.f32 %v1648_v15, %v1666_v17  ;;  %v1708_v33 = vsub.f32 %v1646_v27, %v1670_v30  ;;  %v1859_v27 = vld [vmem:[%s6277_s17] sm:$0xff] }
 0x111   : > { %v1126_v38 = vadd.f32 1.0, %v1125_v35  ;;  %v1119_v39 = vadd.f32 1.0, %v1118_v36  ;;  %v1697_v28 = vand.u32 4294901760, %v1696_v24  ;;  %v1623_v35 = vld [vmem:[%s6275_s24] sm:$0x1]  ;;  %v1672_v36 = vand.u32 4294901760, %v1645_v32 }
 0x112   : > { %v1709_v41 = vand.u32 4294901760, %v1708_v33  ;;  %s6280_s24 = sld [smem:[#allocation16_spill]] }
 0x113   : > { %v1127_v43 = vmul.f32 %v1126_v38, %v1111_v22  ;;  %v1136_v37 = vxor.u32 2147483648, %v1119_v39  ;;  %v1647_v22 = vld [vmem:[%s6274_s11 + $0x10] sm:$0xff]  ;;  %v1698_v21 = vsub.f32 %v1696_v24, %v1697_v28 }
 0x114   : > { %v1668_v25 = vand.u32 4294901760, %v1647_v22 }
 0x115   : > { %v1133_v20 = vxor.u32 2147483648, %v1127_v43  ;;  %v1291_v45 = vsel %vm1289_vm0, %v1136_v37, %v1127_v43  ;;  %v1137_v46 = vsel %vm1135_vm4, %v1136_v37, %v1127_v43  ;;  %v1714_v43 = vsub.f32 %v1645_v32, %v1672_v36 }
 0x116   : > { %v1702_v29 = vsub.f32 %v1647_v22, %v1668_v25  ;;  %v1885_v32 = vand.u32 4294901760, %v1859_v27 }
 0x117   : > { %v1288_v44 = vsel %vm1286_vm15, %v1119_v39, %v1133_v20  ;;  %v1134_v42 = vsel %vm1132_vm3, %v1119_v39, %v1133_v20  ;;  %v1699_v39 = vand.u32 4294901760, %v1698_v21 }
 0x118   : > { %v1292_v47 = vsel %vm1285_vm14, %v1288_v44, %v1291_v45  ;;  %v1138_v48 = vsel %vm1131_vm2, %v1134_v42, %v1137_v46  ;;  %v1703_v4 = vand.u32 4294901760, %v1702_v29  ;;  %v1710_v44 = vsub.f32 %v1708_v33, %v1709_v41 }
 0x119   : > { %v1293_v49 = vsel %vm1128_vm5, nan, %v1292_v47  ;;  %v1139_v50 = vsel %vm1128_vm5, nan, %v1138_v48  ;;  %v1715_v45 = vand.u32 4294901760, %v1714_v43 }
 0x11a   : > { %v1300_v51 = vsel %vm1298_vm1, %v1293_v49, 0  ;;  %v1462_v52 = vsel %vm1298_vm1, %v1139_v50, 0  ;;  %v1704_v40 = vsub.f32 %v1702_v29, %v1703_v4  ;;  %v1711_v46 = vand.u32 4294901760, %v1710_v44 }
 0x11b   : > { %v1320_v53 = vand.u32 4294901760, %v1300_v51  ;;  %v1482_v54 = vand.u32 4294901760, %v1462_v52  ;;  %v1716_v47 = vsub.f32 %v1714_v43, %v1715_v45 }
 0x11c   : > { %v1705_v20 = vand.u32 4294901760, %v1704_v40 }
 0x11d   : > { %1356 = vmatmul.f32.vlgmr.msra.gmra.mxu1 %v1320_v53  ;;  %v1321_v55 = vsub.f32 %v1300_v51, %v1320_v53  ;;  %v1483_v56 = vsub.f32 %v1462_v52, %v1482_v54  ;;  %v1717_v49 = vand.u32 4294901760, %v1716_v47 }
 0x11e   : > { %1563 = vmatpush.msra.mxu1 %v5743_v5 }
 0x11f   : > { %1382 = vmatmul.f32.vlgmr.msra.gmra.mxu2 %v1321_v55  ;;  %v1322_v57 = vand.u32 4294901760, %v1321_v55  ;;  %v1484_v58 = vand.u32 4294901760, %v1483_v56 }
 0x120   : > { %1590 = vmatpush.msra.mxu2 %v1507_v12  ;;  %1565 = vmatpush.msra.mxu1 %v5752_v10 }
 0x121   : > { %1407 = vmatmul.f32.vlgmr.msra.gmra.mxu3 %v1322_v57  ;;  %v1323_v9 = vsub.f32 %v1321_v55, %v1322_v57  ;;  %v1485_v59 = vsub.f32 %v1483_v56, %v1484_v58 }
 0x122   : > { %1615 = vmatpush.msra.mxu3 %v5743_v5  ;;  %1594 = vmatpush.msra.mxu2 %v1513_v23 }
 0x123   : > { %v1324_v60 = vand.u32 4294901760, %v1323_v9  ;;  %v1486_v61 = vand.u32 4294901760, %v1485_v59 }
 0x124   : > { %1617 = vmatpush.msra.mxu3 %v5752_v10 }
 0x125   : > { %1325 = vmatmul.f32.vlgmr.msra.gmra.mxu0 %v1324_v60  ;;  %1457 = vmatmul.f32.vlgmr.msrb.gmra.mxu1 %v1320_v53 }
 0x126   : > { %1538 = vmatpush.msra.mxu0 %v5750_v8  ;;  %1700 = vmatpush.msrb.mxu1 %v1699_v39 }
 0x127   : > { %1487 = vmatmul.f32.vlgmr.msrb.gmra.mxu2 %v1486_v61 }
 0x128   : > { %1541 = vmatpush.msra.mxu0 %v5758_v14  ;;  %1738 = vmatpush.msrb.mxu2 %v1696_v24 }
 0x129   : > { %1518 = vmatmul.f32.vlgmr.msrb.gmra.mxu3 %v1482_v54  ;;  %1706 = vmatpush.msrb.mxu1 %v1705_v20 }
 0x12a   : > { %1767 = vmatpush.msrb.mxu3 %v1666_v17  ;;  %1741 = vmatpush.msrb.mxu2 %v1702_v29 }
 0x12b   : > { %1712 = vmatpush.msrb.mxu1 %v1711_v46 }
 0x12c   : > { %1769 = vmatpush.msrb.mxu3 %v1668_v25  ;;  %1744 = vmatpush.msrb.mxu2 %v1708_v33 }
 0x12d   : > { %1434 = vmatmul.f32.vlgmr.msrb.gmra.mxu0 %v1320_v53  ;;  %1569 = vmatmul.f32.vlgmr.msra.gmra.mxu1 %v1484_v58 }
 0x12e   : > { %1667 = vmatpush.msrb.mxu0 %v1666_v17  ;;  %1771 = vmatpush.msrb.mxu3 %v1670_v30 }
 0x12f   : > { %1596 = vmatmul.f32.vlgmr.msra.gmra.mxu2 %v1482_v54  ;;  %1718 = vmatpush.msrb.mxu1 %v1717_v49 }
 0x130   : > { %1669 = vmatpush.msrb.mxu0 %v1668_v25  ;;  %1773 = vmatpush.msrb.mxu3 %v1672_v36 }
 0x131   : > { %1619 = vmatmul.f32.vlgmr.msra.gmra.mxu3 %v1482_v54  ;;  %1747 = vmatpush.msrb.mxu2 %v1714_v43 }
 0x132   : > { %1671 = vmatpush.msrb.mxu0 %v1670_v30  ;;  %1827 = vmatpush.msra.mxu1 %v1666_v17 }
 0x134   : > { %1673 = vmatpush.msrb.mxu0 %v1672_v36  ;;  %1829 = vmatpush.msra.mxu1 %v1668_v25 }
 0x135   : > { %1544 = vmatmul.f32.vlgmr.msra.gmra.mxu0 %v1483_v56 }
 0x136   : > { %1796 = vmatpush.msra.mxu0 %v1697_v28  ;;  %1831 = vmatpush.msra.mxu1 %v1670_v30 }
 0x138   : > { %1800 = vmatpush.msra.mxu0 %v1703_v4  ;;  %1833 = vmatpush.msra.mxu1 %v1672_v36 }
 0x13a   : > { %1804 = vmatpush.msra.mxu0 %v1709_v41 }
 0x13c   : > { %1808 = vmatpush.msra.mxu0 %v1715_v45 }
 0x19a   : > { %v1357_v62 = vpop.f32.mrf.mxu1 }
 0x1a2   : > { %v1326_v63 = vpop.f32.mrf.mxu0  ;;  %v1383_v0 = vpop.f32.mrf.mxu2 }
 0x1a3   : > { %v1358_v1 = vadd.f32 %v1357_v62, %v1326_v63  ;;  %v1458_v6 = vpop.f32.mrf.mxu1 }
 0x1a4   : > { %v1408_v2 = vpop.f32.mrf.mxu3 }
 0x1a5   : > { %v1384_v3 = vadd.f32 %v1383_v0, %v1358_v1 }
 0x1a7   : > { %v1409_v5 = vadd.f32 %v1408_v2, %v1384_v3 }
 0x1aa   : > { %v1435_v7 = vpop.f32.mrf.mxu0  ;;  %v1488_v8 = vpop.f32.mrf.mxu2 }
 0x1ab   : > { %v1436_v10 = vadd.f32 %v1435_v7, %v1409_v5  ;;  %v1570_v26 = vpop.f32.mrf.mxu1  ;;  %v1649_v5 = vld [vmem:[%s6276_s5] sm:$0x1]  ;;  %s6278_s5 = sld [smem:[#allocation22_spill]] }
 0x1ac   : > { %v1519_v12 = vpop.f32.mrf.mxu3 }
 0x1ad   : > { %v1459_v11 = vadd.f32 %v1458_v6, %v1436_v10  ;;  %v1862_v10 = vld [vmem:[%s6277_s17 + $0x18] sm:$0xff] }
 0x1af   : > { %v1489_v14 = vadd.f32 %v1488_v8, %v1459_v11  ;;  %v1879_v11 = vand.u32 4294901760, %v1862_v10 }
 0x1b1   : > { %v1520_v16 = vadd.f32 %v1519_v12, %v1489_v14  ;;  %v1861_v12 = vld [vmem:[%s6277_s17 + $0x10] sm:$0xff]  ;;  %v1909_v15 = vsub.f32 %v1862_v10, %v1879_v11  ;;  %1880 = vmatpush.msra.mxu2 %v1879_v11 }
 0x1b2   : > { %v1545_v19 = vpop.f32.mrf.mxu0  ;;  %v1597_v31 = vpop.f32.mrf.mxu2 }
 0x1b3   : > { %v1546_v23 = vadd.f32 %v1545_v19, %v1520_v16  ;;  %v1881_v16 = vand.u32 4294901760, %v1861_v12  ;;  %v1860_v19 = vld [vmem:[%s6277_s17 + $0x8] sm:$0xff] }
 0x1b4   : > { %v1620_v34 = vpop.f32.mrf.mxu3  ;;  %v1883_v25 = vand.u32 4294901760, %v1860_v19 }
 0x1b5   : > { %v1571_v13 = vadd.f32 %v1570_v26, %v1546_v23  ;;  %v1910_v23 = vand.u32 4294901760, %v1909_v15  ;;  %v1915_v24 = vsub.f32 %v1861_v12, %v1881_v16  ;;  %1882 = vmatpush.msra.mxu2 %v1881_v16 }
 0x1b6   : > { %v1921_v30 = vsub.f32 %v1860_v19, %v1883_v25 }
 0x1b7   : > { %v1598_v18 = vadd.f32 %v1597_v31, %v1571_v13  ;;  %v1911_v28 = vsub.f32 %v1909_v15, %v1910_v23  ;;  %v1916_v29 = vand.u32 4294901760, %v1915_v24  ;;  %1884 = vmatpush.msra.mxu2 %v1883_v25 }
 0x1b8   : > { %v1922_v33 = vand.u32 4294901760, %v1921_v30 }
 0x1b9   : > { %v1621_v38 = vadd.f32 %v1620_v34, %v1598_v18  ;;  %v1912_v21 = vand.u32 4294901760, %v1911_v28  ;;  %v1917_v4 = vsub.f32 %v1915_v24, %v1916_v29  ;;  %1886 = vmatpush.msra.mxu2 %v1885_v32 }
 0x1ba   : > { %v1923_v39 = vsub.f32 %v1921_v30, %v1922_v33 }
 0x1bb   : > { %v1624_v37 = vadd.f32 %v1623_v35, %v1621_v38  ;;  %v1927_v35 = vsub.f32 %v1859_v27, %v1885_v32  ;;  %1913 = vmatpush.msra.mxu3 %v1912_v21  ;;  %v1918_v38 = vand.u32 4294901760, %v1917_v4 }
 0x1bc   : > { %v1924_v43 = vand.u32 4294901760, %v1923_v39 }
 0x1bd   : > { %v1625_v42 = vsub.f32 0.0, %v1624_v37  ;;  %v1928_v40 = vand.u32 4294901760, %v1927_v35  ;;  %1919 = vmatpush.msra.mxu3 %v1918_v38 }
 0x1bf   : > { %v1626_v48 = vmul.f32 1.442695, %v1625_v42  ;;  %1925 = vmatpush.msra.mxu3 %v1924_v43 }
 0x1c1   : > { %5333 = vpow2.f32 %v1626_v48 }
 0x1c7   : > { %v5334_v50 = vpop.eup %5333 }
 0x1c8   : > { %v1628_v51 = vadd.f32 1.0, %v5334_v50 }
 0x1ca   : > { %5335 = vrcp.f32 %v1628_v51  ;;  %v1640_v55 = vand.u32 2147483648, %v1628_v51  ;;  %v1638_v57 = vand.u32 2147483647, %v1628_v51  ;;  %vm1634_vm7 = vweird.f32 %v1628_v51 }
 0x1cc   : > { %v1641_v9 = vor.u32 1.1754944e-38, %v1640_v55  ;;  %vm1639_vm9 = vcmp.eq.f32.partialorder %v1638_v57, 8.507059e+37 }
 0x1d0   : > { %v5336_v52 = vpop.eup %5335 }
 0x1d1   : > { %v1630_v53 = vmul.f32 %v5336_v52, %v1628_v51  ;;  %vm1635_vm6 = vweird.f32 %v5336_v52 }
 0x1d2   : > { %vm1636_vm8 = vmor %vm1634_vm7, %vm1635_vm6 }
 0x1d3   : > { %v1631_v54 = vsub.f32 1.0, %v1630_v53 }
 0x1d5   : > { %v1632_v56 = vmul.f32 %v5336_v52, %v1631_v54 }
 0x1d7   : > { %v1633_v58 = vadd.f32 %v5336_v52, %v1632_v56 }
 0x1d9   : > { %v1637_v59 = vsel %vm1636_vm8, %v5336_v52, %v1633_v58 }
 0x1da   : > { %v1642_v60 = vsel %vm1639_vm9, %v1641_v9, %v1637_v59 }
 0x1db   : > { %v1644_v61 = vmul.f32 %v1642_v60, %v1624_v37  ;;  %v1929_v37 = vsub.f32 %v1927_v35, %v1928_v40 }
 0x1dd   : > { %v1652_v62 = vsel %vm1650_vm10, %v1644_v61, 0  ;;  %v1930_v44 = vand.u32 4294901760, %v1929_v37 }
 0x1de   : > { %v1674_v63 = vand.u32 4294901760, %v1652_v62 }
 0x1df   : > { %1931 = vmatpush.msra.mxu3 %v1930_v44 }
 0x1e0   : > { %1720 = vmatmul.f32.vlgmr.msrb.gmra.mxu1 %v1674_v63  ;;  %v1675_v0 = vsub.f32 %v1652_v62, %v1674_v63  ;;  %v1863_v62 = vld [vmem:[%s6278_s5] sm:$0x1] }
 0x1e1   : > { %1980 = vmatpush.msrb.mxu1 %v1879_v11 }
 0x1e2   : > { %1750 = vmatmul.f32.vlgmr.msrb.gmra.mxu2 %v1675_v0  ;;  %v1676_v1 = vand.u32 4294901760, %v1675_v0 }
 0x1e3   : > { %1982 = vmatpush.msrb.mxu1 %v1881_v16  ;;  %2009 = vmatpush.msrb.mxu2 %v1910_v23 }
 0x1e4   : > { %1777 = vmatmul.f32.vlgmr.msrb.gmra.mxu3 %v1676_v1  ;;  %v1677_v2 = vsub.f32 %v1675_v0, %v1676_v1  ;;  %v5330_v1 = vld [vmem:[%s6279_s9 + $0x1] ss:$0 sm:$0xff] }
 0x1e5   : > { %1984 = vmatpush.msrb.mxu1 %v1883_v25  ;;  %2013 = vmatpush.msrb.mxu2 %v1916_v29 }
 0x1e6   : > { %v1678_v3 = vand.u32 4294901760, %v1677_v2  ;;  %2040 = vmatpush.msrb.mxu3 %v1879_v11  ;;  %v5331_v2 = vld [vmem:[%s6279_s9] ss:$0 sm:$0xff] }
 0x1e7   : > { %1986 = vmatpush.msrb.mxu1 %v1885_v32  ;;  %2017 = vmatpush.msrb.mxu2 %v1922_v33 }
 0x1e8   : > { %1679 = vmatmul.f32.vlgmr.msrb.gmra.mxu0 %v1678_v3  ;;  %1835 = vmatmul.f32.vlgmr.msra.gmra.mxu1 %v1674_v63 }
 0x1e9   : > { %1951 = vmatpush.msrb.mxu0 %v1909_v15  ;;  %2021 = vmatpush.msrb.mxu2 %v1928_v40 }
 0x1ea   : > { %2042 = vmatpush.msrb.mxu3 %v1881_v16 }
 0x1eb   : > { %1954 = vmatpush.msrb.mxu0 %v1915_v24 }
 0x1ec   : > { %2044 = vmatpush.msrb.mxu3 %v1883_v25 }
 0x1ed   : > { %1957 = vmatpush.msrb.mxu0 %v1921_v30 }
 0x1ee   : > { %2046 = vmatpush.msrb.mxu3 %v1885_v32 }
 0x1ef   : > { %1960 = vmatpush.msrb.mxu0 %v1927_v35 }
 0x1f0   : > { %1810 = vmatmul.f32.vlgmr.msra.gmra.mxu0 %v1674_v63 }
 0x25d   : > { %v1721_v6 = vpop.f32.mrf.mxu1 }
 0x265   : > { %v1680_v7 = vpop.f32.mrf.mxu0  ;;  %v1751_v17 = vpop.f32.mrf.mxu2 }
 0x266   : > { %v1681_v8 = vadd.f32 %v1680_v7, %v1649_v5  ;;  %v1836_v34 = vpop.f32.mrf.mxu1  ;;  %v2064_v5 = vpop.permute.xlu1 %2063 }
 0x267   : > { %v1778_v26 = vpop.f32.mrf.mxu3 }
 0x268   : > { %v1722_v14 = vadd.f32 %v1721_v6, %v1681_v8  ;;  %v2057_v6 = vpop.permute.xlu0 %2056  ;;  %v2067_v8 = vmul.f32 %v5330_v1, %v2064_v5 }
 0x269   : > { %v2060_v11 = vmul.f32 %v5331_v2, %v2057_v6 }
 0x26a   : > { %v1752_v22 = vadd.f32 %v1751_v17, %v1722_v14  ;;  %v5332_v17 = vld [vmem:[%s6280_s24] ss:$0 sm:$0xff] }
 0x26b   : > { %v2068_v19 = vadd.f32 %v2067_v8, %v2060_v11 }
 0x26c   : > { %v1779_v13 = vadd.f32 %v1778_v26, %v1752_v22 }
 0x26d   : > { %v1811_v31 = vpop.f32.mrf.mxu0  ;;  %v2073_v25 = vadd.f32 %v5332_v17, %v2068_v19 }
 0x26e   : > { %v1812_v18 = vadd.f32 %v1811_v31, %v1779_v13 }
 0x270   : > { %v1837_v36 = vadd.f32 %v1836_v34, %v1812_v18 }
 0x272   : > { %v1839_v41 = vsub.f32 0.0, %v1837_v36 }
 0x274   : > { %v1840_v20 = vmul.f32 1.442695, %v1839_v41 }
 0x276   : > { %5337 = vpow2.f32 %v1840_v20 }
 0x27c   : > { %v5338_v45 = vpop.eup %5337 }
 0x27d   : > { %v1842_v42 = vadd.f32 1.0, %v5338_v45 }
 0x27f   : > { %5339 = vrcp.f32 %v1842_v42  ;;  %v1854_v49 = vand.u32 2147483648, %v1842_v42  ;;  %v1852_v51 = vand.u32 2147483647, %v1842_v42  ;;  %vm1848_vm12 = vweird.f32 %v1842_v42 }
 0x281   : > { %v1855_v53 = vor.u32 1.1754944e-38, %v1854_v49  ;;  %vm1853_vm14 = vcmp.eq.f32.partialorder %v1852_v51, 8.507059e+37 }
 0x285   : > { %v5340_v46 = vpop.eup %5339 }
 0x286   : > { %v1844_v47 = vmul.f32 %v5340_v46, %v1842_v42  ;;  %vm1849_vm11 = vweird.f32 %v5340_v46 }
 0x287   : > { %vm1850_vm13 = vmor %vm1848_vm12, %vm1849_vm11 }
 0x288   : > { %v1845_v48 = vsub.f32 1.0, %v1844_v47 }
 0x28a   : > { %v1846_v50 = vmul.f32 %v5340_v46, %v1845_v48 }
 0x28c   : > { %v1847_v52 = vadd.f32 %v5340_v46, %v1846_v50 }
 0x28e   : > { %v1851_v54 = vsel %vm1850_vm13, %v5340_v46, %v1847_v52 }
 0x28f   : > { %v1856_v55 = vsel %vm1853_vm14, %v1855_v53, %v1851_v54 }
 0x290   : > { %v1858_v56 = vmul.f32 %v1856_v55, %v1837_v36 }
 0x292   : > { %v1865_v57 = vsel %vm1650_vm10, %v1858_v56, 0 }
 0x293   : > { %v1887_v58 = vand.u32 4294901760, %v1865_v57 }
 0x295   : > { %1933 = vmatmul.f32.vlgmr.msra.gmra.mxu3 %v1887_v58  ;;  %v1888_v9 = vsub.f32 %v1865_v57, %v1887_v58 }
 0x297   : > { %1963 = vmatmul.f32.vlgmr.msrb.gmra.mxu0 %v1888_v9  ;;  %v1889_v59 = vand.u32 4294901760, %v1888_v9 }
 0x299   : > { %1990 = vmatmul.f32.vlgmr.msrb.gmra.mxu1 %v1889_v59  ;;  %v1890_v60 = vsub.f32 %v1888_v9, %v1889_v59 }
 0x29b   : > { %v1891_v61 = vand.u32 4294901760, %v1890_v60 }
 0x29d   : > { %1892 = vmatmul.f32.vlgmr.msra.gmra.mxu2 %v1891_v61  ;;  %2048 = vmatmul.f32.vlgmr.msrb.gmra.mxu3 %v1887_v58 }
 0x2a5   : > { %2023 = vmatmul.f32.vlgmr.msrb.gmra.mxu2 %v1887_v58 }
 0x314   : > { %v1964_v10 = vpop.f32.mrf.mxu0 }
 0x316   : > { %v1991_v14 = vpop.f32.mrf.mxu1 }
 0x318   : > { %v1934_v63 = vpop.f32.mrf.mxu3 }
 0x320   : > { %v1893_v0 = vpop.f32.mrf.mxu2  ;;  %v2049_v23 = vpop.f32.mrf.mxu3 }
 0x321   : > { %v1894_v3 = vadd.f32 %v1893_v0, %v1863_v62 }
 0x323   : > { %v1935_v7 = vadd.f32 %v1934_v63, %v1894_v3 }
 0x325   : > { %v1965_v12 = vadd.f32 %v1964_v10, %v1935_v7 }
 0x327   : > { %v1992_v15 = vadd.f32 %v1991_v14, %v1965_v12 }
 0x328   : > { %v2024_v16 = vpop.f32.mrf.mxu2 }
 0x329   : > { %v2025_v22 = vadd.f32 %v2024_v16, %v1992_v15 }
 0x32b   : > { %v2050_v24 = vadd.f32 %v2049_v23, %v2025_v22 }
 0x32d   : > { %v2074_v26 = vperm.slane %v2050_v24, 0 }
 0x32f   : > { %v2075_v27 = vadd.f32 %v2074_v26, %v2073_v25 }
 0x331   : > { %2076 = vst.msk [vmem:[#allocation2] sm:$0xff] %vm1650_vm10, %v2075_v27 }
 0x332 PF: > { %s6281_s4 = sld [smem:[#allocation11_spill]]  ;;  %vm2099_vm15 = vcmask 261120   ;;  %s6282_s25 = scalar_lea.vmem %s6215_s12, %s5605_s28  ;;  %vm2120_vm0 = vcmask 64512   ;;  %vm2158_vm1 = vcmask 1043456   ;;  %vm2359_vm2 = vcmask 130048  }
 0x333   : > { %v5341_v31 = vld [vmem:[%s6282_s25] ss:$0 sm:$0xff]  ;;  %s5420_s3 = smov 104   ;;  %s5421_s26 = smov 120   ;;  %vm2361_vm3 = vcmask 195584  }
 0x334   : > { %s5422_s29 = smov 96   ;;  %s5423_s30 = smov 80  }
 0x335   : > { %s5424_s8 = smov 72   ;;  %s5425_s24 = smov 88  }
 0x336   : > { %s5427_s27 = smov 64   ;;  %s5428_s5 = smov 40  }
 0x337   : > { %s5429_s25 = smov 56  }
 0x338   : > { %v5101_v13 = vld [vmem:[%s6281_s4 + $0x8] sm:$0xff]  ;;  %v5100_v28 = vld [vmem:[%s6281_s4] sm:$0xff]  ;;  %s5426_s4 = smov 112  }
 0x339   : > { %v5830_v29 = vld [vmem:[#allocation2] sm:$0xff]  ;;  %2109 = vmatpush.bf16.msra.mxu0 %v5101_v13 }
 0x33a   : > { %v2078_v30 = vpack.c.bf16 %v5830_v29, %v5830_v29 }
 0x33d   : > { %2110 = vmatpush.bf16.msra.mxu0 %v5100_v28 }
 0x340   : > { %4419 = vmatmul.msk.bf16.vlgmr.msra.gmra.mxu0 %vm2099_vm15, %v2078_v30 }
 0x3bd   : > { %v2112_v32 = vpop.f32.mrf.mxu0 }
 0x3be   : > { %v2113_v18 = vadd.f32 %v5341_v31, %v2112_v32 }
 0x3c0   : > { %v5840_v21 = vpack.c.bf16 %v2113_v18, %v2113_v18 }
 0x3c2   : > { %2289 = vrot.lane.b32.xlu2 %v5840_v21, %s5420_s3  ;;  %2175 = vrot.lane.b32.xlu1 %v5840_v21, %s5421_s26  ;;  %s5430_s3 = smov 48   ;;  %s5431_s26 = smov 8  }
 0x3c3   : > { %2118 = vrot.lane.b32.xlu0 %v5840_v21, %s5422_s29  ;;  %s5432_s29 = smov 16  }
 0x3c5   : > { %v2114_v4 = vpop.f32.mrf.mxu0 }
 0x3ca   : > { %2234 = vrot.lane.b32.xlu2 %v5840_v21, %s5423_s30  ;;  %2291 = vrot.lane.b32.xlu1 %v5840_v21, %s5424_s8  ;;  %s5433_s30 = smov 24   ;;  %s6286_s8 = sld [smem:[#allocation5_spill]] }
 0x3cb   : > { %2177 = vrot.lane.b32.xlu0 %v5840_v21, %s5425_s24 }
 0x3d0   : > { %p5093_p8 = scmp.ne.s32.totalorder %s6286_s8, 1 }
 0x3d3   : > { %2232 = vrot.lane.b32.xlu0 %v5840_v21, %s5426_s4  ;;  %s6283_s4 = scalar_lea.vmem %s6217_s14, %s5605_s28 }
 0x41c   : > { %v2290_v33 = vpop.permute.xlu2 %2289 }
 0x424   : > { %v2235_v34 = vpop.permute.xlu2 %2234 }
 0x425   : > { %v2240_v35 = vsel %vm2120_vm0, %v2235_v34, 0 }
 0x426   : > { %2249 = vmatpush.bf16.xpose.msrb.mxu0 %v2240_v35 }
 0x434   : > { %v2176_v36 = vpop.permute.xlu1 %2175 }
 0x435   : > { %v2119_v38 = vpop.permute.xlu0 %2118 }
 0x436   : > { %v2125_v39 = vsel %vm2120_vm0, %v2119_v38, 0 }
 0x437   : > { %2134 = vmatpush.bf16.xpose.msra.mxu1 %v2125_v39 }
 0x43c   : > { %v2292_v40 = vpop.permute.xlu1 %2291 }
 0x43d   : > { %v2178_v41 = vpop.permute.xlu0 %2177  ;;  %v2297_v43 = vsel %vm2120_vm0, %v2292_v40, 0 }
 0x43e   : > { %4420 = vmatmul.msk.bf16.vlgmr.msra.gmra.mxu1 %vm2120_vm0, %v5840_v21  ;;  %v2183_v37 = vsel %vm2120_vm0, %v2178_v41, 0 }
 0x43f   : > { %2192 = vmatpush.bf16.xpose.msra.mxu3 %v2183_v37 }
 0x445   : > { %v2233_v20 = vpop.permute.xlu0 %2232 }
 0x446   : > { %4422 = vmatmul.msk.bf16.vlgmr.msra.gmra.mxu3 %vm2120_vm0, %v2176_v36  ;;  %4424 = vmatmul.msk.bf16.vlgmr.msrb.gmra.mxu0 %vm2120_vm0, %v2233_v20 }
 0x447   : > { %2306 = vmatpush.bf16.xpose.msrb.mxu3 %v2297_v43 }
 0x456   : > { %4426 = vmatmul.msk.bf16.vlgmr.msrb.gmra.mxu3 %vm2120_vm0, %v2290_v33 }
 0x4bb   : > { %v2136_v44 = vpop.f32.mrf.mxu1 }
 0x4bc   : > { %v2140_v45 = vmul.f32 0.35355338, %v2136_v44 }
 0x4be   : > { %v2141_v42 = vsel %vm2120_vm0, %v2140_v45, -inf }
 0x4bf   : > { %2142 = vmax.xlane.f32.xlu1 %v2141_v42 }
 0x4c3   : > { %v2138_v46 = vpop.f32.mrf.mxu1  ;;  %v2251_v47 = vpop.f32.mrf.mxu0 }
 0x4c4   : > { %v2255_v52 = vmul.f32 0.35355338, %v2251_v47 }
 0x4c6   : > { %v2256_v54 = vsel %vm2120_vm0, %v2255_v52, -inf }
 0x4c9   : > { %v2194_v48 = vpop.f32.mrf.mxu3 }
 0x4ca   : > { %v2198_v49 = vmul.f32 0.35355338, %v2194_v48  ;;  %v5103_v48 = vld [vmem:[%s5623_s10 + $0x8] sm:$0xff] }
 0x4cb   : > { %v2253_v50 = vpop.f32.mrf.mxu0  ;;  %2393 = vmatpush.bf16.msra.mxu0 %v5103_v48  ;;  %v4455_v48 = vld [vmem:[%s5646_s13 + $0x10] sm:$0xf] }
 0x4cc   : > { %v2199_v51 = vsel %vm2120_vm0, %v2198_v49, -inf }
 0x4cd   : > { %2200 = vmax.xlane.f32.xlu2 %v2199_v51 }
 0x4d1   : > { %v2196_v53 = vpop.f32.mrf.mxu3 }
 0x4d5   : > { %2257 = vmax.xlane.f32.xlu2 %v2256_v54 }
 0x4d9   : > { %v2308_v55 = vpop.f32.mrf.mxu3 }
 0x4da   : > { %v2312_v56 = vmul.f32 0.35355338, %v2308_v55 }
 0x4dc   : > { %v2313_v57 = vsel %vm2120_vm0, %v2312_v56, -inf }
 0x4dd   : > { %2314 = vmax.xlane.f32.xlu0 %v2313_v57  ;;  %v5342_v57 = vld [vmem:[%s6283_s4] ss:$0 sm:$0xff] }
 0x4e1   : > { %v2310_v58 = vpop.f32.mrf.mxu3 }
 0x4ed   : > { %2153 = vrot.lane.b32.xlu2 %v5840_v21, %s5427_s27 }
 0x4f5   : > { %2325 = vrot.lane.b32.xlu2 %v5840_v21, %s5428_s5  ;;  %s6284_s5 = scalar_lea.vmem %s6218_s15, %s5605_s28 }
 0x532   : > { %v2143_v9 = vpop.xlane.xlu1 %2142 }
 0x533   : > { %v2144_v59 = vsub.f32 %v2140_v45, %v2143_v9 }
 0x535   : > { %v2145_v60 = vmul.f32 1.442695, %v2144_v59 }
 0x537   : > { %5348 = vpow2.f32 %v2145_v60 }
 0x53d   : > { %v5349_v61 = vpop.eup %5348 }
 0x53e   : > { %v2147_v62 = vsel %vm2120_vm0, %v5349_v61, 0.0 }
 0x53f   : > { %2148 = vadd.xlane.f32.xlu1 %v2147_v62  ;;  %v5434_v62 = vmov 32.0  }
 0x540   : > { %v2201_v63 = vpop.xlane.xlu2 %2200 }
 0x541   : > { %v2202_v2 = vsub.f32 %v2198_v49, %v2201_v63  ;;  %v5102_v49 = vld [vmem:[%s5623_s10] sm:$0xff]  ;;  %s6287_s10 = sld [smem:[#allocation27_spill]] (!%p5093_p8) }
 0x542   : > { %2394 = vmatpush.bf16.msra.mxu0 %v5102_v49 }
 0x543   : > { %v2203_v5 = vmul.f32 1.442695, %v2202_v2 }
 0x548   : > { %v2258_v0 = vpop.xlane.xlu2 %2257 }
 0x549   : > { %v2259_v1 = vsub.f32 %v2255_v52, %v2258_v0 }
 0x54b   : > { %v2260_v3 = vmul.f32 1.442695, %v2259_v1 }
 0x54d   : > { %5350 = vpow2.f32 %v2260_v3 }
 0x54e   : > { %5352 = vpow2.f32 %v2203_v5 }
 0x550   : > { %v2154_v6 = vpop.permute.xlu2 %2153  ;;  %v2315_v7 = vpop.xlane.xlu0 %2314 }
 0x551   : > { %v2160_v10 = vsel %vm2158_vm1, %v2154_v6, 0  ;;  %v2316_v11 = vsub.f32 %v2312_v56, %v2315_v7 }
 0x552   : > { %2169 = vmatpush.bf16.msra.mxu2 %v2160_v10 }
 0x553   : > { %v5351_v8 = vpop.eup %5350  ;;  %v2317_v14 = vmul.f32 1.442695, %v2316_v11  ;;  %v4503_v11 = vld [vmem:[%s5646_s13 + $0x80] sm:$0xf] }
 0x554   : > { %v2262_v12 = vsel %vm2120_vm0, %v5351_v8, 0.0  ;;  %v5353_v15 = vpop.eup %5352 }
 0x555   : > { %2263 = vadd.xlane.f32.xlu0 %v2262_v12  ;;  %5354 = vpow2.f32 %v2317_v14  ;;  %v2205_v16 = vsel %vm2120_vm0, %v5353_v15, 0.0  ;;  %v5128_v12 = vld [vmem:[%s5646_s13 + $0xbc] sm:$0xf0]  ;;  %v5120_v14 = vld [vmem:[%s5646_s13 + $0x84] sm:$0xf] }
 0x558   : > { %2211 = vrot.lane.b32.xlu1 %v5840_v21, %s5429_s25  ;;  %v2326_v27 = vpop.permute.xlu2 %2325 }
 0x559   : > { %v2331_v30 = vsel %vm2158_vm1, %v2326_v27, 0  ;;  %v4439_v27 = vld [vmem:[%s5646_s13] sm:$0xf] }
 0x55b   : > { %v5355_v17 = vpop.eup %5354 }
 0x55c   : > { %v2319_v19 = vsel %vm2120_vm0, %v5355_v17, 0.0 }
 0x55d   : > { %2206 = vadd.xlane.f32.xlu0 %v2205_v16  ;;  %v4505_v16 = vld [vmem:[%s5646_s13 + $0xc0] sm:$0xf0] }
 0x565   : > { %2320 = vadd.xlane.f32.xlu0 %v2319_v19  ;;  %v5129_v19 = vld [vmem:[%s5646_s13 + $0xc4] sm:$0xf0] }
 0x579   : > { %2268 = vrot.lane.b32.xlu0 %v5840_v21, %s5430_s3 }
 0x5b2   : > { %v2149_v22 = vpop.xlane.xlu1 %2148 }
 0x5b3   : > { %5356 = vrcp.f32 %v2149_v22  ;;  %v4508_v22 = vor.u32 %v5120_v14, %v4505_v16  ;;  %v5124_v14 = vld [vmem:[%s5646_s13 + $0xa4] sm:$0xf]  ;;  %v4543_v16 = vld [vmem:[%s5646_s13 + $0xa8] sm:$0xf] }
 0x5b5   : > { %2691 = vmatpush.bf16.msra.mxu3 %v4508_v22  ;;  %v5125_v22 = vld [vmem:[%s5646_s13 + $0xac] sm:$0xf] }
 0x5b9   : > { %v5357_v23 = vpop.eup %5356 }
 0x5ba   : > { %v2151_v24 = vmul.f32 %v5357_v23, %v5349_v61 }
 0x5bc   : > { %v2152_v25 = vpack.c.bf16 %v2151_v24, %v2151_v24  ;;  %v5121_v24 = vld [vmem:[%s5646_s13 + $0x8c] sm:$0xf] }
 0x5be   : > { %4421 = vmatmul.msk.bf16.vlgmr.msra.gmra.mxu2 %vm2120_vm0, %v2152_v25  ;;  %v4513_v25 = vld [vmem:[%s5646_s13 + $0xc8] sm:$0xf0] }
 0x5c8   : > { %v2264_v26 = vpop.xlane.xlu0 %2263 }
 0x5ca   : > { %v2212_v13 = vpop.permute.xlu1 %2211 }
 0x5cb   : > { %v2217_v28 = vsel %vm2158_vm1, %v2212_v13, 0  ;;  %v5112_v13 = vld [vmem:[%s5646_s13 + $0x3c] sm:$0xf0] }
 0x5cc   : > { %2226 = vmatpush.bf16.msrb.mxu2 %v2217_v28  ;;  %v5104_v28 = vld [vmem:[%s5646_s13 + $0x4] sm:$0xf] }
 0x5d0   : > { %2340 = vmatpush.bf16.msra.mxu2 %v2331_v30  ;;  %v2207_v31 = vpop.xlane.xlu0 %2206  ;;  %v4440_v30 = vor.u32 %v5112_v13, %v4439_v27  ;;  %v5116_v27 = vld [vmem:[%s5646_s13 + $0x5c] sm:$0xf0] }
 0x5d1   : > { %5358 = vrcp.f32 %v2207_v31  ;;  %v4441_v31 = vld [vmem:[%s5646_s13 + $0x40] sm:$0xf0] }
 0x5d7   : > { %v5359_v32 = vpop.eup %5358 }
 0x5d8   : > { %v2209_v18 = vmul.f32 %v5359_v32, %v5353_v15  ;;  %v2321_v21 = vpop.xlane.xlu0 %2320  ;;  %v4504_v15 = vor.u32 %v5128_v12, %v4503_v11  ;;  %v4447_v32 = vld [vmem:[%s5646_s13 + $0x8] sm:$0xf]  ;;  %v4535_v11 = vld [vmem:[%s5646_s13 + $0xa0] sm:$0xf] }
 0x5d9   : > { %5360 = vrcp.f32 %v2321_v21  ;;  %v4444_v21 = vor.u32 %v5104_v28, %v4441_v31  ;;  %v5132_v12 = vld [vmem:[%s5646_s13 + $0xdc] sm:$0xf0]  ;;  %v4473_v31 = vld [vmem:[%s5646_s13 + $0x60] sm:$0xf0] }
 0x5da   : > { %v2210_v4 = vpack.c.bf16 %v2209_v18, %v2209_v18  ;;  %5362 = vrcp.f32 %v2264_v26  ;;  %v4516_v26 = vor.u32 %v5121_v24, %v4513_v25  ;;  %v5113_v18 = vld [vmem:[%s5646_s13 + $0x44] sm:$0xf0]  ;;  %v4536_v24 = vor.u32 %v5132_v12, %v4535_v11  ;;  %v5164_v11 = vld [vmem:[%s5652_s0 + $0xe0] sm:$0xff] }
 0x5db   : > { %5364 = vrcp.f32 %v5434_v62  ;;  %2692 = vmatpush.bf16.msra.mxu3 %v4444_v21  ;;  %v5109_v21 = vld [vmem:[%s5646_s13 + $0x2c] sm:$0xf]  ;;  %v5148_v12 = vld [vmem:[%s5652_s0 + $0x60] sm:$0xff] }
 0x5dc   : > { %4423 = vmatmul.msk.bf16.vlgmr.msrb.gmra.mxu2 %vm2120_vm0, %v2210_v4  ;;  %2717 = vmatpush.bf16.msrb.mxu0 %v4516_v26  ;;  %v4448_v4 = vor.u32 %v5113_v18, %v4447_v32  ;;  %v4471_v26 = vld [vmem:[%s5646_s13 + $0x20] sm:$0xf]  ;;  %v4479_v32 = vld [vmem:[%s5646_s13 + $0x28] sm:$0xf] }
 0x5dd   : > { %v5117_v18 = vld [vmem:[%s5646_s13 + $0x64] sm:$0xf0] }
 0x5df   : > { %v5361_v33 = vpop.eup %5360 }
 0x5e0   : > { %v2323_v34 = vmul.f32 %v5361_v33, %v5355_v17  ;;  %v5363_v35 = vpop.eup %5362  ;;  %v4511_v17 = vld [vmem:[%s5646_s13 + $0x88] sm:$0xf]  ;;  %v5105_v33 = vld [vmem:[%s5646_s13 + $0xc] sm:$0xf] }
 0x5e1   : > { %v2266_v36 = vmul.f32 %v5363_v35, %v5351_v8  ;;  %v5365_v63 = vpop.eup %5364  ;;  %v4512_v23 = vor.u32 %v5129_v19, %v4511_v17  ;;  %v5133_v19 = vld [vmem:[%s5646_s13 + $0xe4] sm:$0xf0] }
 0x5e2   : > { %v2324_v38 = vpack.c.bf16 %v2323_v34, %v2323_v34  ;;  %v2405_v0 = vmul.f32 32.0, %v5365_v63  ;;  %vm2409_vm4 = vweird.f32 %v5365_v63  ;;  %v4449_v34 = vld [vmem:[%s5646_s13 + $0x48] sm:$0xf0]  ;;  %v4544_v13 = vor.u32 %v5133_v19, %v4543_v16  ;;  %v5163_v16 = vld [vmem:[%s5652_s0 + $0xd8] sm:$0xff] }
 0x5e3   : > { %v2267_v41 = vpack.c.bf16 %v2266_v36, %v2266_v36  ;;  %2704 = vmatpush.bf16.msrb.mxu2 %v4512_v23  ;;  %v4452_v35 = vor.u32 %v5105_v33, %v4449_v34  ;;  %v4545_v23 = vld [vmem:[%s5646_s13 + $0xe8] sm:$0xf0]  ;;  %v4472_v33 = vor.u32 %v5116_v27, %v4471_v26  ;;  %v5147_v19 = vld [vmem:[%s5652_s0 + $0x58] sm:$0xff]  ;;  %v5154_v26 = vld [vmem:[%s5652_s0 + $0x90] sm:$0xff] }
 0x5e4   : > { %v2406_v1 = vsub.f32 1.0, %v2405_v0  ;;  %v4548_v28 = vor.u32 %v5125_v22, %v4545_v23  ;;  %v5155_v22 = vld [vmem:[%s5652_s0 + $0x98] sm:$0xff]  ;;  %v5138_v23 = vld [vmem:[%s5652_s0 + $0x10] sm:$0xff]  ;;  %v5137_v27 = vld [vmem:[%s5652_s0 + $0x8] sm:$0xff] }
 0x5e5   : > { %2718 = vmatpush.bf16.msrb.mxu0 %v4452_v35  ;;  %v4480_v35 = vor.u32 %v5117_v18, %v4479_v32  ;;  %v5175_v32 = vld [vmem:[%s5652_s0 + $0x138] sm:$0xff] }
 0x5e6   : > { %v2407_v2 = vmul.f32 %v5365_v63, %v2406_v1  ;;  %v5199_v18 = vld [vmem:[%s5652_s0 + $0x1f8] sm:$0xff] }
 0x5e7   : > { %2705 = vmatpush.bf16.msrb.mxu2 %v4448_v4  ;;  %v4481_v4 = vld [vmem:[%s5646_s13 + $0x68] sm:$0xf0] }
 0x5e8   : > { %v2408_v3 = vadd.f32 %v5365_v63, %v2407_v2 }
 0x5ea   : > { %v5889_v5 = vsel %vm2409_vm4, %v5365_v63, %v2408_v3  ;;  %v5343_v3 = vld [vmem:[%s6284_s5] ss:$0 sm:$0xff] }
 0x5eb   : > { %v2269_v39 = vpop.permute.xlu0 %2268 }
 0x5ec   : > { %4427 = vmatmul.msk.bf16.vlgmr.msra.gmra.mxu2 %vm2120_vm0, %v2324_v38  ;;  %v2274_v40 = vsel %vm2158_vm1, %v2269_v39, 0  ;;  %v4519_v38 = vld [vmem:[%s5646_s13 + $0x90] sm:$0xf] }
 0x5ed   : > { %2283 = vmatpush.bf16.msrb.mxu1 %v2274_v40  ;;  %v5130_v39 = vld [vmem:[%s5646_s13 + $0xcc] sm:$0xf0]  ;;  %v5122_v40 = vld [vmem:[%s5646_s13 + $0x94] sm:$0xf] }
 0x5f0   : > { %4425 = vmatmul.msk.bf16.vlgmr.msrb.gmra.mxu1 %vm2120_vm0, %v2267_v41 }
 0x5f1   : > { %2678 = vmatpush.bf16.msra.mxu1 %v4504_v15  ;;  %v4537_v15 = vld [vmem:[%s5646_s13 + $0xe0] sm:$0xf0] }
 0x5f2   : > { %v4540_v25 = vor.u32 %v5124_v14, %v4537_v15  ;;  %v5156_v14 = vld [vmem:[%s5652_s0 + $0xa0] sm:$0xff]  ;;  %v5139_v15 = vld [vmem:[%s5652_s0 + $0x18] sm:$0xff] }
 0x5f5   : > { %2679 = vmatpush.bf16.msra.mxu1 %v4440_v30  ;;  %v5108_v30 = vld [vmem:[%s5646_s13 + $0x24] sm:$0xf] }
 0x5f6   : > { %v4476_v34 = vor.u32 %v5108_v30, %v4473_v31  ;;  %v5136_v30 = vld [vmem:[%s5652_s0] sm:$0xff] }
 0x5f7   : > { %v5160_v31 = vld [vmem:[%s5652_s0 + $0xc0] sm:$0xff] }
 0x641   : > { %v2171_v43 = vpop.f32.mrf.mxu2 }
 0x649   : > { %v2173_v37 = vpop.f32.mrf.mxu2 }
 0x64a   : > { %v4521_v37 = vld [vmem:[%s5646_s13 + $0xd0] sm:$0xf0] }
 0x65f   : > { %v2228_v20 = vpop.f32.mrf.mxu2 }
 0x660   : > { %2347 = vrot.lane.b32.xlu1 %v2228_v20, %s5431_s26  ;;  %v4527_v20 = vld [vmem:[%s5646_s13 + $0x98] sm:$0xf]  ;;  %s6285_s26 = scalar_lea.vmem %s6219_s16, %s5605_s28 }
 0x667   : > { %v2230_v44 = vpop.f32.mrf.mxu2 }
 0x668   : > { %v5131_v44 = vld [vmem:[%s5646_s13 + $0xd4] sm:$0xf0] }
 0x66d   : > { %v2285_v45 = vpop.f32.mrf.mxu1 }
 0x66e   : > { %2351 = vrot.lane.b32.xlu2 %v2285_v45, %s5432_s29  ;;  %v4524_v45 = vor.u32 %v5122_v40, %v4521_v37  ;;  %v5126_v40 = vld [vmem:[%s5646_s13 + $0xb4] sm:$0xf]  ;;  %v5135_v37 = vld [vmem:[%s5646_s13 + $0xf4] sm:$0xf0] }
 0x66f   : > { %v2342_v42 = vpop.f32.mrf.mxu2 }
 0x670   : > { %2355 = vrot.lane.b32.xlu1 %v2342_v42, %s5433_s30  ;;  %v4528_v42 = vor.u32 %v5131_v44, %v4527_v20  ;;  %2743 = vmatpush.bf16.msrb.mxu3 %v4524_v45  ;;  %v5127_v20 = vld [vmem:[%s5646_s13 + $0xbc] sm:$0xf] }
 0x671   : > { %v4561_v44 = vld [vmem:[%s5646_s13 + $0xf8] sm:$0xf0] }
 0x672   : > { %2756 = vmatpush.bf16.msra.mxu2 %v4528_v42 }
 0x675   : > { %v2287_v46 = vpop.f32.mrf.mxu1 }
 0x676   : > { %v5123_v46 = vld [vmem:[%s5646_s13 + $0x9c] sm:$0xf] }
 0x677   : > { %v2344_v47 = vpop.f32.mrf.mxu2 }
 0x678   : > { %v4529_v47 = vld [vmem:[%s5646_s13 + $0xd8] sm:$0xf0] }
 0x6c8   : > { %v2352_v52 = vpop.permute.xlu2 %2351 }
 0x6d2   : > { %v2348_v50 = vpop.permute.xlu1 %2347 }
 0x6d3   : > { %v2358_v51 = vsel %vm2120_vm0, %v2171_v43, %v2348_v50  ;;  %v4520_v43 = vor.u32 %v5130_v39, %v4519_v38  ;;  %v4532_v50 = vor.u32 %v5123_v46, %v4529_v47  ;;  %v4551_v38 = vld [vmem:[%s5646_s13 + $0xb0] sm:$0xf] }
 0x6d4   : > { %v2360_v54 = vsel %vm2359_vm2, %v2358_v51, %v2352_v52  ;;  %v5114_v51 = vld [vmem:[%s5646_s13 + $0x4c] sm:$0xf0]  ;;  %v5106_v52 = vld [vmem:[%s5646_s13 + $0x14] sm:$0xf] }
 0x6d5   : > { %2730 = vmatpush.bf16.msrb.mxu1 %v4520_v43  ;;  %v5134_v39 = vld [vmem:[%s5646_s13 + $0xec] sm:$0xf0]  ;;  %v4559_v43 = vld [vmem:[%s5646_s13 + $0xb8] sm:$0xf] }
 0x6d6   : > { %v4552_v45 = vor.u32 %v5134_v39, %v4551_v38  ;;  %v4487_v46 = vld [vmem:[%s5646_s13 + $0x30] sm:$0xf] }
 0x6d7   : > { %v5118_v47 = vld [vmem:[%s5646_s13 + $0x6c] sm:$0xf0] }
 0x6d8   : > { %v5182_v38 = vld [vmem:[%s5652_s0 + $0x170] sm:$0xff] }
 0x6d9   : > { %v5190_v39 = vld [vmem:[%s5652_s0 + $0x1b0] sm:$0xff] }
 0x6e2   : > { %v2356_v53 = vpop.permute.xlu1 %2355 }
 0x6e3   : > { %v2362_v55 = vsel %vm2361_vm3, %v2360_v54, %v2356_v53  ;;  %v4456_v53 = vor.u32 %v5114_v51, %v4455_v48  ;;  %v4457_v54 = vld [vmem:[%s5646_s13 + $0x50] sm:$0xf0]  ;;  %v4560_v48 = vor.u32 %v5135_v37, %v4559_v43  ;;  %v5181_v43 = vld [vmem:[%s5652_s0 + $0x168] sm:$0xff] }
 0x6e4   : > { %v2363_v56 = vpack.c.bf16 %v2362_v55, %v2362_v55  ;;  %v4463_v55 = vld [vmem:[%s5646_s13 + $0x18] sm:$0xf]  ;;  %v4489_v51 = vld [vmem:[%s5646_s13 + $0x70] sm:$0xf0]  ;;  %v5189_v37 = vld [vmem:[%s5652_s0 + $0x1a8] sm:$0xff] }
 0x6e5   : > { %2731 = vmatpush.bf16.msrb.mxu1 %v4456_v53  ;;  %v5119_v53 = vld [vmem:[%s5646_s13 + $0x74] sm:$0xf0] }
 0x6e6   : > { %4436 = vmatmul.msk.bf16.vlgmr.msra.gmra.mxu0 %vm2099_vm15, %v2363_v56  ;;  %v5115_v56 = vld [vmem:[%s5646_s13 + $0x54] sm:$0xf0] }
 0x6e7   : > { %2769 = vmatpush.bf16.msra.mxu0 %v4532_v50  ;;  %v5110_v50 = vld [vmem:[%s5646_s13 + $0x34] sm:$0xf] }
 0x763   : > { %v2396_v58 = vpop.f32.mrf.mxu0 }
 0x764   : > { %v2397_v9 = vadd.f32 %v5342_v57, %v2396_v58  ;;  %v4460_v57 = vor.u32 %v5106_v52, %v4457_v54  ;;  %v4464_v58 = vor.u32 %v5115_v56, %v4463_v55  ;;  %v4495_v52 = vld [vmem:[%s5646_s13 + $0x38] sm:$0xf]  ;;  %v5111_v54 = vld [vmem:[%s5646_s13 + $0x3c] sm:$0xf]  ;;  %v4488_v56 = vor.u32 %v5118_v47, %v4487_v46 }
 0x765   : > { %v4497_v55 = vld [vmem:[%s5646_s13 + $0x78] sm:$0xf0] }
 0x766   : > { %v2400_v59 = vadd.f32 %v2397_v9, %v5830_v29  ;;  %v5107_v9 = vld [vmem:[%s5646_s13 + $0x1c] sm:$0xf]  ;;  %2744 = vmatpush.bf16.msrb.mxu3 %v4460_v57  ;;  %2757 = vmatpush.bf16.msra.mxu2 %v4464_v58  ;;  %v4492_v57 = vor.u32 %v5110_v50, %v4489_v51  ;;  %v4496_v58 = vor.u32 %v5119_v53, %v4495_v52  ;;  %v5169_v52 = vld [vmem:[%s5652_s0 + $0x108] sm:$0xff] }
 0x767   : > { %v5171_v46 = vld [vmem:[%s5652_s0 + $0x118] sm:$0xff]  ;;  %v5193_v53 = vld [vmem:[%s5652_s0 + $0x1c8] sm:$0xff] }
 0x768   : > { %v2401_v60 = vsel %vm2099_vm15, %v2400_v59, 0.0  ;;  %v5195_v47 = vld [vmem:[%s5652_s0 + $0x1d8] sm:$0xff] }
 0x769   : > { %2402 = vadd.xlane.f32.xlu2 %v2401_v60  ;;  %v5179_v50 = vld [vmem:[%s5652_s0 + $0x158] sm:$0xff] }
 0x76a   : > { %v5187_v51 = vld [vmem:[%s5652_s0 + $0x198] sm:$0xff] }
 0x76b   : > { %v2398_v61 = vpop.f32.mrf.mxu0 }
 0x7dc   : > { %v2403_v29 = vpop.xlane.xlu2 %2402 }
 0x7dd   : > { %v2411_v6 = vmul.f32 %v5889_v5, %v2403_v29 }
 0x7df   : > { %v5892_v7 = vsub.f32 %v2400_v59, %v2411_v6  ;;  %v4465_v59 = vld [vmem:[%s5646_s13 + $0x58] sm:$0xf0]  ;;  %v5344_v6 = vld [vmem:[%s6285_s26] ss:$0 sm:$0xff] }
 0x7e0   : > { %v4468_v60 = vor.u32 %v5107_v9, %v4465_v59  ;;  %v4500_v9 = vor.u32 %v5111_v54, %v4497_v55  ;;  %v5143_v59 = vld [vmem:[%s5652_s0 + $0x38] sm:$0xff]  ;;  %v5178_v54 = vld [vmem:[%s5652_s0 + $0x150] sm:$0xff] }
 0x7e1   : > { %v2413_v10 = vmul.f32 %v5892_v7, %v5892_v7  ;;  %v5186_v55 = vld [vmem:[%s5652_s0 + $0x190] sm:$0xff] }
 0x7e2   : > { %2770 = vmatpush.bf16.msra.mxu0 %v4468_v60  ;;  %v5167_v60 = vld [vmem:[%s5652_s0 + $0xf8] sm:$0xff] }
 0x7e3   : > { %v2414_v8 = vsel %vm2099_vm15, %v2413_v10, 0.0 }
 0x7e4   : > { %2415 = vadd.xlane.f32.xlu1 %v2414_v8 }
 0x857   : > { %v2416_v36 = vpop.xlane.xlu1 %2415 }
 0x858   : > { %v2417_v41 = vmul.f32 %v2416_v36, %v5889_v5  ;;  %v4484_v36 = vor.u32 %v5109_v21, %v4481_v4  ;;  %v5144_v21 = vld [vmem:[%s5652_s0 + $0x40] sm:$0xff] }
 0x859   : > { %v5152_v4 = vld [vmem:[%s5652_s0 + $0x80] sm:$0xff] }
 0x85a   : > { %v2418_v49 = vadd.f32 1e-05, %v2417_v41  ;;  %v4553_v41 = vld [vmem:[%s5646_s13 + $0xf0] sm:$0xf0] }
 0x85b   : > { %v4556_v42 = vor.u32 %v5126_v40, %v4553_v41  ;;  %v5173_v40 = vld [vmem:[%s5652_s0 + $0x128] sm:$0xff] }
 0x85c   : > { %5366 = vrsqrt.f32 %v2418_v49  ;;  %vm2425_vm6 = vweird.f32 %v2418_v49  ;;  %v5197_v41 = vld [vmem:[%s5652_s0 + $0x1e8] sm:$0xff] }
 0x862   : > { %v5367_v61 = vpop.eup %5366 }
 0x863   : > { %v2420_v62 = vmul.f32 %v5367_v61, %v2418_v49  ;;  %vm2426_vm5 = vweird.f32 %v5367_v61  ;;  %v4564_v49 = vor.u32 %v5127_v20, %v4561_v44  ;;  %v5172_v20 = vld [vmem:[%s5652_s0 + $0x120] sm:$0xff] }
 0x864   : > { %vm2427_vm7 = vmor %vm2425_vm6, %vm2426_vm5  ;;  %v5196_v44 = vld [vmem:[%s5652_s0 + $0x1e0] sm:$0xff] }
 0x865   : > { %v2421_v63 = vmul.f32 %v5367_v61, %v2420_v62  ;;  %v5159_v62 = vld [vmem:[%s5652_s0 + $0xb8] sm:$0xff] }
 0x867   : > { %v2422_v0 = vmul.f32 0.5, %v2421_v63  ;;  %v5142_v63 = vld [vmem:[%s5652_s0 + $0x30] sm:$0xff] }
 0x869   : > { %v2423_v1 = vsub.f32 1.5, %v2422_v0  ;;  %v5166_v0 = vld [vmem:[%s5652_s0 + $0xf0] sm:$0xff] }
 0x86b   : > { %v2424_v2 = vmul.f32 %v5367_v61, %v2423_v1  ;;  %v5150_v1 = vld [vmem:[%s5652_s0 + $0x70] sm:$0xff] }
 0x86d   : > { %v2428_v29 = vsel %vm2427_vm7, %v5367_v61, %v2424_v2  ;;  %v5151_v61 = vld [vmem:[%s5652_s0 + $0x78] sm:$0xff]  ;;  %v5158_v2 = vld [vmem:[%s5652_s0 + $0xb0] sm:$0xff] }
 0x86e   : > { %v2429_v10 = vmul.f32 %v2428_v29, %v5892_v7  ;;  %v5165_v29 = vld [vmem:[%s5652_s0 + $0xe8] sm:$0xff] }
 0x870   : > { %v2434_v8 = vmul.f32 %v5343_v3, %v2429_v10  ;;  %v5141_v3 = vld [vmem:[%s5652_s0 + $0x28] sm:$0xff] }
 0x871   : > { %v5157_v10 = vld [vmem:[%s5652_s0 + $0xa8] sm:$0xff] }
 0x872   : > { %v5946_v17 = vadd.f32 %v5344_v6, %v2434_v8  ;;  %v5149_v6 = vld [vmem:[%s5652_s0 + $0x68] sm:$0xff]  ;;  %v5140_v8 = vld [vmem:[%s5652_s0 + $0x20] sm:$0xff] }
 0x874   : > { %v5953_v7 = vpack.c.bf16 %v5946_v17, %v5946_v17 }
 0x876   : > { %4565 = vmatmul.msk.bf16.vlgmr.msra.gmra.mxu1 %vm2099_vm15, %v5953_v7  ;;  %4566 = vmatmul.msk.bf16.vlgmr.msra.gmra.mxu3 %vm2099_vm15, %v5953_v7 }
 0x877   : > { %4567 = vmatmul.msk.bf16.vlgmr.msrb.gmra.mxu2 %vm2099_vm15, %v5953_v7  ;;  %4568 = vmatmul.msk.bf16.vlgmr.msrb.gmra.mxu0 %vm2099_vm15, %v5953_v7 }
 0x878   : > { %2782 = vmatpush.bf16.msra.mxu1 %v4536_v24  ;;  %2795 = vmatpush.bf16.msra.mxu3 %v4540_v25  ;;  %v5162_v24 = vld [vmem:[%s5652_s0 + $0xd0] sm:$0xff] }
 0x879   : > { %2808 = vmatpush.bf16.msrb.mxu2 %v4544_v13  ;;  %2821 = vmatpush.bf16.msrb.mxu0 %v4548_v28  ;;  %v5146_v25 = vld [vmem:[%s5652_s0 + $0x50] sm:$0xff]  ;;  %v5145_v13 = vld [vmem:[%s5652_s0 + $0x48] sm:$0xff] }
 0x87a   : > { %v5153_v28 = vld [vmem:[%s5652_s0 + $0x88] sm:$0xff] }
 0x87c   : > { %2783 = vmatpush.bf16.msra.mxu1 %v4472_v33  ;;  %2796 = vmatpush.bf16.msra.mxu3 %v4476_v34  ;;  %v5183_v33 = vld [vmem:[%s5652_s0 + $0x178] sm:$0xff] }
 0x87d   : > { %2809 = vmatpush.bf16.msrb.mxu2 %v4480_v35  ;;  %2822 = vmatpush.bf16.msrb.mxu0 %v4484_v36  ;;  %v5191_v34 = vld [vmem:[%s5652_s0 + $0x1b8] sm:$0xff]  ;;  %v5174_v35 = vld [vmem:[%s5652_s0 + $0x130] sm:$0xff] }
 0x87e   : > { %v5198_v36 = vld [vmem:[%s5652_s0 + $0x1f0] sm:$0xff] }
 0x886   : > { %4569 = vmatmul.msk.bf16.vlgmr.msrb.gmra.mxu1 %vm2099_vm15, %v5953_v7  ;;  %4570 = vmatmul.msk.bf16.vlgmr.msrb.gmra.mxu3 %vm2099_vm15, %v5953_v7 }
 0x887   : > { %4571 = vmatmul.msk.bf16.vlgmr.msra.gmra.mxu2 %vm2099_vm15, %v5953_v7  ;;  %4572 = vmatmul.msk.bf16.vlgmr.msra.gmra.mxu0 %vm2099_vm15, %v5953_v7 }
 0x888   : > { %2834 = vmatpush.bf16.msrb.mxu1 %v4552_v45  ;;  %2847 = vmatpush.bf16.msrb.mxu3 %v4556_v42  ;;  %v5180_v45 = vld [vmem:[%s5652_s0 + $0x160] sm:$0xff] }
 0x889   : > { %2860 = vmatpush.bf16.msra.mxu2 %v4560_v48  ;;  %2873 = vmatpush.bf16.msra.mxu0 %v4564_v49  ;;  %v5188_v42 = vld [vmem:[%s5652_s0 + $0x1a0] sm:$0xff]  ;;  %v5170_v48 = vld [vmem:[%s5652_s0 + $0x110] sm:$0xff] }
 0x88a   : > { %v5194_v49 = vld [vmem:[%s5652_s0 + $0x1d0] sm:$0xff] }
 0x88c   : > { %2835 = vmatpush.bf16.msrb.mxu1 %v4488_v56  ;;  %2848 = vmatpush.bf16.msrb.mxu3 %v4492_v57  ;;  %v5168_v56 = vld [vmem:[%s5652_s0 + $0x100] sm:$0xff] }
 0x88d   : > { %2861 = vmatpush.bf16.msra.mxu2 %v4496_v58  ;;  %2874 = vmatpush.bf16.msra.mxu0 %v4500_v9  ;;  %v5192_v57 = vld [vmem:[%s5652_s0 + $0x1c0] sm:$0xff]  ;;  %v5177_v58 = vld [vmem:[%s5652_s0 + $0x148] sm:$0xff] }
 0x88e   : > { %v5185_v9 = vld [vmem:[%s5652_s0 + $0x188] sm:$0xff] }
 0x896   : > { %4573 = vmatmul.msk.bf16.vlgmr.msra.gmra.mxu1 %vm2099_vm15, %v5953_v7  ;;  %4574 = vmatmul.msk.bf16.vlgmr.msra.gmra.mxu3 %vm2099_vm15, %v5953_v7 }
 0x897   : > { %4575 = vmatmul.msk.bf16.vlgmr.msrb.gmra.mxu2 %vm2099_vm15, %v5953_v7  ;;  %4576 = vmatmul.msk.bf16.vlgmr.msrb.gmra.mxu0 %vm2099_vm15, %v5953_v7 }
 0x898   : > { %3940 = vmatpush.bf16.msra.mxu1 %v5143_v59  ;;  %3979 = vmatpush.bf16.msrb.mxu0 %v5167_v60  ;;  %v5176_v59 = vld [vmem:[%s5652_s0 + $0x140] sm:$0xff] }
 0x899   : > { %3953 = vmatpush.bf16.msra.mxu3 %v5151_v61  ;;  %3966 = vmatpush.bf16.msrb.mxu2 %v5159_v62  ;;  %v5184_v60 = vld [vmem:[%s5652_s0 + $0x180] sm:$0xff] }
 0x89a   : > { %v6076_v61 = vld [vmem:[%s5641_s1] sm:$0xff] }
 0x89b   : > { %v2477_v62 = vperm.slane %v6076_v61, 0 }
 0x89c   : > { %3941 = vmatpush.bf16.msra.mxu1 %v5142_v63  ;;  %3980 = vmatpush.bf16.msrb.mxu0 %v5166_v0  ;;  %v2480_v63 = vperm.slane %v6076_v61, 3 }
 0x89d   : > { %3954 = vmatpush.bf16.msra.mxu3 %v5150_v1  ;;  %3967 = vmatpush.bf16.msrb.mxu2 %v5158_v2 }
 0x8a0   : > { %3942 = vmatpush.bf16.msra.mxu1 %v5141_v3  ;;  %3981 = vmatpush.bf16.msrb.mxu0 %v5165_v29 }
 0x8a1   : > { %3955 = vmatpush.bf16.msra.mxu3 %v5149_v6  ;;  %3968 = vmatpush.bf16.msrb.mxu2 %v5157_v10  ;;  %v2478_v6 = vperm.slane %v6076_v61, 1 }
 0x8a4   : > { %3943 = vmatpush.bf16.msra.mxu1 %v5140_v8  ;;  %3982 = vmatpush.bf16.msrb.mxu0 %v5164_v11  ;;  %v2479_v8 = vperm.slane %v6076_v61, 2  ;;  %v5207_v11 = vld [vmem:[%s5652_s0 + $0x238] sm:$0xff] }
 0x8a5   : > { %3956 = vmatpush.bf16.msra.mxu3 %v5148_v12  ;;  %3969 = vmatpush.bf16.msrb.mxu2 %v5156_v14  ;;  %v5231_v14 = vld [vmem:[%s5652_s0 + $0x2f8] sm:$0xff] }
 0x8a6   : > { %4577 = vmatmul.msk.bf16.vlgmr.msrb.gmra.mxu1 %vm2099_vm15, %v5953_v7  ;;  %4578 = vmatmul.msk.bf16.vlgmr.msrb.gmra.mxu3 %vm2099_vm15, %v5953_v7 }
 0x8a7   : > { %4579 = vmatmul.msk.bf16.vlgmr.msra.gmra.mxu2 %vm2099_vm15, %v5953_v7  ;;  %4580 = vmatmul.msk.bf16.vlgmr.msra.gmra.mxu0 %vm2099_vm15, %v5953_v7  ;;  %v5161_v7 = vld [vmem:[%s5652_s0 + $0xc8] sm:$0xff] }
 0x8a8   : > { %3944 = vmatpush.bf16.msra.mxu1 %v5139_v15  ;;  %3983 = vmatpush.bf16.msrb.mxu0 %v5163_v16 }
 0x8a9   : > { %3957 = vmatpush.bf16.msra.mxu3 %v5147_v19  ;;  %3970 = vmatpush.bf16.msrb.mxu2 %v5155_v22 }
 0x8ac   : > { %3945 = vmatpush.bf16.msra.mxu1 %v5138_v23  ;;  %3984 = vmatpush.bf16.msrb.mxu0 %v5162_v24 }
 0x8ad   : > { %3958 = vmatpush.bf16.msra.mxu3 %v5146_v25  ;;  %3971 = vmatpush.bf16.msrb.mxu2 %v5154_v26  ;;  %v5206_v25 = vld [vmem:[%s5652_s0 + $0x230] sm:$0xff] }
 0x8b0   : > { %3946 = vmatpush.bf16.msra.mxu1 %v5137_v27  ;;  %3985 = vmatpush.bf16.msrb.mxu0 %v5161_v7  ;;  %v5230_v7 = vld [vmem:[%s5652_s0 + $0x2f0] sm:$0xff] }
 0x8b1   : > { %3959 = vmatpush.bf16.msra.mxu3 %v5145_v13  ;;  %3972 = vmatpush.bf16.msrb.mxu2 %v5153_v28  ;;  %v5215_v28 = vld [vmem:[%s5652_s0 + $0x278] sm:$0xff] }
 0x8b4   : > { %3947 = vmatpush.bf16.msra.mxu1 %v5136_v30  ;;  %3986 = vmatpush.bf16.msrb.mxu0 %v5160_v31  ;;  %v5223_v31 = vld [vmem:[%s5652_s0 + $0x2b8] sm:$0xff] }
 0x8b5   : > { %3960 = vmatpush.bf16.msra.mxu3 %v5144_v21  ;;  %3973 = vmatpush.bf16.msrb.mxu2 %v5152_v4  ;;  %v5229_v21 = vld [vmem:[%s5652_s0 + $0x2e8] sm:$0xff]  ;;  %v2481_v4 = vperm.slane %v6076_v61, 4 }
 0x8b8   : > { %3992 = vmatpush.bf16.msrb.mxu1 %v5175_v32  ;;  %4031 = vmatpush.bf16.msra.mxu0 %v5199_v18  ;;  %v5205_v18 = vld [vmem:[%s5652_s0 + $0x228] sm:$0xff] }
 0x8b9   : > { %4005 = vmatpush.bf16.msrb.mxu3 %v5183_v33  ;;  %4018 = vmatpush.bf16.msra.mxu2 %v5191_v34  ;;  %v2484_v34 = vperm.slane %v6076_v61, 7 }
 0x8bc   : > { %3993 = vmatpush.bf16.msrb.mxu1 %v5174_v35  ;;  %4032 = vmatpush.bf16.msra.mxu0 %v5198_v36  ;;  %v5214_v35 = vld [vmem:[%s5652_s0 + $0x270] sm:$0xff] }
 0x8bd   : > { %4006 = vmatpush.bf16.msrb.mxu3 %v5182_v38  ;;  %4019 = vmatpush.bf16.msra.mxu2 %v5190_v39  ;;  %v5222_v38 = vld [vmem:[%s5652_s0 + $0x2b0] sm:$0xff] }
 0x8c0   : > { %3994 = vmatpush.bf16.msrb.mxu1 %v5173_v40  ;;  %4033 = vmatpush.bf16.msra.mxu0 %v5197_v41  ;;  %v5204_v40 = vld [vmem:[%s5652_s0 + $0x220] sm:$0xff] }
 0x8c1   : > { %4007 = vmatpush.bf16.msrb.mxu3 %v5181_v43  ;;  %4020 = vmatpush.bf16.msra.mxu2 %v5189_v37  ;;  %v5228_v37 = vld [vmem:[%s5652_s0 + $0x2e0] sm:$0xff] }
 0x8c4   : > { %3995 = vmatpush.bf16.msrb.mxu1 %v5172_v20  ;;  %4034 = vmatpush.bf16.msra.mxu0 %v5196_v44  ;;  %v5213_v44 = vld [vmem:[%s5652_s0 + $0x268] sm:$0xff] }
 0x8c5   : > { %4008 = vmatpush.bf16.msrb.mxu3 %v5180_v45  ;;  %4021 = vmatpush.bf16.msra.mxu2 %v5188_v42  ;;  %v5221_v42 = vld [vmem:[%s5652_s0 + $0x2a8] sm:$0xff] }
 0x8c8   : > { %3996 = vmatpush.bf16.msrb.mxu1 %v5171_v46  ;;  %4035 = vmatpush.bf16.msra.mxu0 %v5195_v47  ;;  %v2482_v46 = vperm.slane %v6076_v61, 5 }
 0x8c9   : > { %4009 = vmatpush.bf16.msrb.mxu3 %v5179_v50  ;;  %4022 = vmatpush.bf16.msra.mxu2 %v5187_v51  ;;  %v5227_v51 = vld [vmem:[%s5652_s0 + $0x2d8] sm:$0xff] }
 0x8cc   : > { %3997 = vmatpush.bf16.msrb.mxu1 %v5170_v48  ;;  %4036 = vmatpush.bf16.msra.mxu0 %v5194_v49  ;;  %v2483_v48 = vperm.slane %v6076_v61, 6  ;;  %v5203_v49 = vld [vmem:[%s5652_s0 + $0x218] sm:$0xff] }
 0x8cd   : > { %4010 = vmatpush.bf16.msrb.mxu3 %v5178_v54  ;;  %4023 = vmatpush.bf16.msra.mxu2 %v5186_v55  ;;  %v5212_v54 = vld [vmem:[%s5652_s0 + $0x260] sm:$0xff] }
 0x8d0   : > { %3998 = vmatpush.bf16.msrb.mxu1 %v5169_v52  ;;  %4037 = vmatpush.bf16.msra.mxu0 %v5193_v53 }
 0x8d1   : > { %4011 = vmatpush.bf16.msrb.mxu3 %v5177_v58  ;;  %4024 = vmatpush.bf16.msra.mxu2 %v5185_v9 }
 0x8d4   : > { %3999 = vmatpush.bf16.msrb.mxu1 %v5168_v56  ;;  %4038 = vmatpush.bf16.msra.mxu0 %v5192_v57  ;;  %v5220_v57 = vld [vmem:[%s5652_s0 + $0x2a0] sm:$0xff] }
 0x8d5   : > { %4012 = vmatpush.bf16.msrb.mxu3 %v5176_v59  ;;  %4025 = vmatpush.bf16.msra.mxu2 %v5184_v60  ;;  %v5202_v59 = vld [vmem:[%s5652_s0 + $0x210] sm:$0xff] }
 0x8f3   : > { %v2681_v0 = vpop.f32.mrf.mxu1 }
 0x8f4   : > { %v2682_v1 = vadd.f32 %v2681_v0, %v2477_v62  ;;  %v2720_v2 = vpop.f32.mrf.mxu0  ;;  %v5226_v62 = vld [vmem:[%s5652_s0 + $0x2d0] sm:$0xff]  ;;  %v5211_v0 = vld [vmem:[%s5652_s0 + $0x258] sm:$0xff] }
 0x8f5   : > { %v2721_v3 = vadd.f32 %v2720_v2, %v2480_v63 }
 0x8f6   : > { %v2880_v29 = vmax.f32 %v2682_v1, 0.0  ;;  %v6108_v1 = vld [vmem:[%s5641_s1 + $0x8] sm:$0xff] }
 0x8f7   : > { %v2883_v10 = vmax.f32 %v2721_v3, 0.0  ;;  %v5219_v3 = vld [vmem:[%s5652_s0 + $0x298] sm:$0xff] }
 0x8f8   : > { %v2896_v12 = vpack.c.bf16 %v2880_v29, %v2880_v29 }
 0x8f9   : > { %v2899_v15 = vpack.c.bf16 %v2883_v10, %v2883_v10  ;;  %v2694_v16 = vpop.f32.mrf.mxu3  ;;  %v5225_v10 = vld [vmem:[%s5652_s0 + $0x2c8] sm:$0xff] }
 0x8fa   : > { %v2695_v19 = vadd.f32 %v2694_v16, %v2478_v6  ;;  %v2707_v22 = vpop.f32.mrf.mxu2  ;;  %3948 = vmatmul.bf16.vlgmr.msra.gmra.mxu1 %v2896_v12  ;;  %v5201_v6 = vld [vmem:[%s5652_s0 + $0x208] sm:$0xff]  ;;  %v2488_v12 = vperm.slane %v6108_v1, 3  ;;  %v5218_v16 = vld [vmem:[%s5652_s0 + $0x290] sm:$0xff] }
 0x8fb   : > { %v2708_v23 = vadd.f32 %v2707_v22, %v2479_v8  ;;  %3987 = vmatmul.bf16.vlgmr.msrb.gmra.mxu0 %v2899_v15  ;;  %4044 = vmatpush.bf16.msra.mxu1 %v5207_v11  ;;  %v2683_v24 = vpop.f32.mrf.mxu1  ;;  %v2485_v8 = vperm.slane %v6108_v1, 0  ;;  %v5200_v22 = vld [vmem:[%s5652_s0 + $0x200] sm:$0xff] }
 0x8fc   : > { %v2881_v26 = vmax.f32 %v2695_v19, 0.0  ;;  %4083 = vmatpush.bf16.msrb.mxu0 %v5231_v14  ;;  %v2722_v27 = vpop.f32.mrf.mxu0  ;;  %v5210_v14 = vld [vmem:[%s5652_s0 + $0x250] sm:$0xff] }
 0x8fd   : > { %v2882_v13 = vmax.f32 %v2708_v23, 0.0 }
 0x8fe   : > { %v2897_v30 = vpack.c.bf16 %v2881_v26, %v2881_v26  ;;  %v5239_v26 = vld [vmem:[%s5652_s0 + $0x338] sm:$0xff] }
 0x8ff   : > { %v2898_v32 = vpack.c.bf16 %v2882_v13, %v2882_v13  ;;  %4045 = vmatpush.bf16.msra.mxu1 %v5206_v25  ;;  %v5224_v25 = vld [vmem:[%s5652_s0 + $0x2c0] sm:$0xff]  ;;  %v5209_v13 = vld [vmem:[%s5652_s0 + $0x248] sm:$0xff] }
 0x900   : > { %4084 = vmatpush.bf16.msrb.mxu0 %v5230_v7  ;;  %3961 = vmatmul.bf16.vlgmr.msra.gmra.mxu3 %v2897_v30  ;;  %v5263_v7 = vld [vmem:[%s5652_s0 + $0x3f8] sm:$0xff]  ;;  %v5217_v30 = vld [vmem:[%s5652_s0 + $0x288] sm:$0xff] }
 0x901   : > { %3974 = vmatmul.bf16.vlgmr.msrb.gmra.mxu2 %v2898_v32  ;;  %4057 = vmatpush.bf16.msra.mxu3 %v5215_v28  ;;  %v2696_v33 = vpop.f32.mrf.mxu3 }
 0x902   : > { %4070 = vmatpush.bf16.msrb.mxu2 %v5223_v31  ;;  %v2709_v36 = vpop.f32.mrf.mxu2  ;;  %v2486_v31 = vperm.slane %v6108_v1, 1 }
 0x903   : > { %4046 = vmatpush.bf16.msra.mxu1 %v5205_v18  ;;  %v2733_v39 = vpop.f32.mrf.mxu1  ;;  %v2487_v18 = vperm.slane %v6108_v1, 2  ;;  %v5208_v36 = vld [vmem:[%s5652_s0 + $0x240] sm:$0xff] }
 0x904   : > { %4085 = vmatpush.bf16.msrb.mxu0 %v5229_v21  ;;  %v2734_v41 = vadd.f32 %v2733_v39, %v2481_v4  ;;  %v2772_v43 = vpop.f32.mrf.mxu0  ;;  %v5238_v4 = vld [vmem:[%s5652_s0 + $0x330] sm:$0xff] }
 0x905   : > { %v2773_v20 = vadd.f32 %v2772_v43, %v2484_v34  ;;  %4058 = vmatpush.bf16.msra.mxu3 %v5214_v35  ;;  %v5262_v35 = vld [vmem:[%s5652_s0 + $0x3f0] sm:$0xff] }
 0x906   : > { %v2884_v45 = vmax.f32 %v2734_v41, 0.0  ;;  %4071 = vmatpush.bf16.msrb.mxu2 %v5222_v38  ;;  %v5247_v41 = vld [vmem:[%s5652_s0 + $0x378] sm:$0xff] }
 0x907   : > { %v2887_v47 = vmax.f32 %v2773_v20, 0.0  ;;  %4047 = vmatpush.bf16.msra.mxu1 %v5204_v40  ;;  %v5216_v40 = vld [vmem:[%s5652_s0 + $0x280] sm:$0xff]  ;;  %v5255_v20 = vld [vmem:[%s5652_s0 + $0x3b8] sm:$0xff] }
 0x908   : > { %v2900_v50 = vpack.c.bf16 %v2884_v45, %v2884_v45  ;;  %4086 = vmatpush.bf16.msrb.mxu0 %v5228_v37 }
 0x909   : > { %v2903_v52 = vpack.c.bf16 %v2887_v47, %v2887_v47  ;;  %4059 = vmatpush.bf16.msra.mxu3 %v5213_v44  ;;  %v2746_v53 = vpop.f32.mrf.mxu3  ;;  %v5261_v47 = vld [vmem:[%s5652_s0 + $0x3e8] sm:$0xff] }
 0x90a   : > { %4072 = vmatpush.bf16.msrb.mxu2 %v5221_v42  ;;  %v2747_v55 = vadd.f32 %v2746_v53, %v2482_v46  ;;  %v2759_v56 = vpop.f32.mrf.mxu2  ;;  %4000 = vmatmul.bf16.vlgmr.msrb.gmra.mxu1 %v2900_v50  ;;  %v5237_v42 = vld [vmem:[%s5652_s0 + $0x328] sm:$0xff] }
 0x90b   : > { %v2760_v58 = vadd.f32 %v2759_v56, %v2483_v48  ;;  %4039 = vmatmul.bf16.vlgmr.msra.gmra.mxu0 %v2903_v52  ;;  %4048 = vmatpush.bf16.msra.mxu1 %v5203_v49  ;;  %v2735_v9 = vpop.f32.mrf.mxu1  ;;  %v5246_v49 = vld [vmem:[%s5652_s0 + $0x370] sm:$0xff]  ;;  %v5236_v52 = vld [vmem:[%s5652_s0 + $0x320] sm:$0xff]  ;;  %v5245_v56 = vld [vmem:[%s5652_s0 + $0x368] sm:$0xff] }
 0x90c   : > { %v2885_v60 = vmax.f32 %v2747_v55, 0.0  ;;  %4087 = vmatpush.bf16.msrb.mxu0 %v5227_v51  ;;  %v2774_v61 = vpop.f32.mrf.mxu0  ;;  %v5254_v51 = vld [vmem:[%s5652_s0 + $0x3b0] sm:$0xff] }
 0x90d   : > { %v2886_v63 = vmax.f32 %v2760_v58, 0.0  ;;  %4060 = vmatpush.bf16.msra.mxu3 %v5212_v54  ;;  %v5260_v54 = vld [vmem:[%s5652_s0 + $0x3e0] sm:$0xff]  ;;  %v5253_v58 = vld [vmem:[%s5652_s0 + $0x3a8] sm:$0xff] }
 0x90e   : > { %v2901_v2 = vpack.c.bf16 %v2885_v60, %v2885_v60  ;;  %4073 = vmatpush.bf16.msrb.mxu2 %v5220_v57  ;;  %v5259_v60 = vld [vmem:[%s5652_s0 + $0x3d8] sm:$0xff]  ;;  %v5244_v61 = vld [vmem:[%s5652_s0 + $0x360] sm:$0xff] }
 0x90f   : > { %v2902_v29 = vpack.c.bf16 %v2886_v63, %v2886_v63  ;;  %4049 = vmatpush.bf16.msra.mxu1 %v5202_v59  ;;  %v5235_v59 = vld [vmem:[%s5652_s0 + $0x318] sm:$0xff]  ;;  %v5234_v63 = vld [vmem:[%s5652_s0 + $0x310] sm:$0xff] }
 0x910   : > { %4088 = vmatpush.bf16.msrb.mxu0 %v5226_v62  ;;  %4013 = vmatmul.bf16.vlgmr.msrb.gmra.mxu3 %v2901_v2  ;;  %v5252_v62 = vld [vmem:[%s5652_s0 + $0x3a0] sm:$0xff] }
 0x911   : > { %4026 = vmatmul.bf16.vlgmr.msra.gmra.mxu2 %v2902_v29  ;;  %4061 = vmatpush.bf16.msra.mxu3 %v5211_v0  ;;  %v2748_v11 = vpop.f32.mrf.mxu3  ;;  %v2489_v0 = vperm.slane %v6108_v1, 4  ;;  %v2492_v29 = vperm.slane %v6108_v1, 7 }
 0x912   : > { %4074 = vmatpush.bf16.msrb.mxu2 %v5219_v3  ;;  %v2761_v15 = vpop.f32.mrf.mxu2  ;;  %v5258_v3 = vld [vmem:[%s5652_s0 + $0x3d0] sm:$0xff]  ;;  %v5251_v11 = vld [vmem:[%s5652_s0 + $0x398] sm:$0xff] }
 0x913   : > { %4050 = vmatpush.bf16.msra.mxu1 %v5201_v6  ;;  %v2785_v19 = vpop.f32.mrf.mxu1 }
 0x914   : > { %4089 = vmatpush.bf16.msrb.mxu0 %v5225_v10  ;;  %v2786_v23 = vadd.f32 %v2785_v19, %v2485_v8  ;;  %v2824_v24 = vpop.f32.mrf.mxu0  ;;  %v5243_v10 = vld [vmem:[%s5652_s0 + $0x358] sm:$0xff] }
 0x915   : > { %v2825_v27 = vadd.f32 %v2824_v24, %v2488_v12  ;;  %4062 = vmatpush.bf16.msra.mxu3 %v5210_v14  ;;  %v5233_v14 = vld [vmem:[%s5652_s0 + $0x308] sm:$0xff]  ;;  %v5250_v24 = vld [vmem:[%s5652_s0 + $0x390] sm:$0xff] }
 0x916   : > { %v2888_v28 = vmax.f32 %v2786_v23, 0.0  ;;  %4075 = vmatpush.bf16.msrb.mxu2 %v5218_v16  ;;  %v5257_v16 = vld [vmem:[%s5652_s0 + $0x3c8] sm:$0xff]  ;;  %v2490_v23 = vperm.slane %v6108_v1, 5 }
 0x917   : > { %v2891_v32 = vmax.f32 %v2825_v27, 0.0  ;;  %4051 = vmatpush.bf16.msra.mxu1 %v5200_v22  ;;  %v5242_v22 = vld [vmem:[%s5652_s0 + $0x350] sm:$0xff] }
 0x918   : > { %v2904_v21 = vpack.c.bf16 %v2888_v28, %v2888_v28  ;;  %4090 = vmatpush.bf16.msrb.mxu0 %v5224_v25  ;;  %v2491_v25 = vperm.slane %v6108_v1, 6 }
 0x919   : > { %v2907_v33 = vpack.c.bf16 %v2891_v32, %v2891_v32  ;;  %4063 = vmatpush.bf16.msra.mxu3 %v5209_v13  ;;  %v2798_v34 = vpop.f32.mrf.mxu3  ;;  %v5256_v13 = vld [vmem:[%s5652_s0 + $0x3c0] sm:$0xff] }
 0x91a   : > { %4076 = vmatpush.bf16.msrb.mxu2 %v5217_v30  ;;  %v2799_v38 = vadd.f32 %v2798_v34, %v2486_v31  ;;  %v2811_v39 = vpop.f32.mrf.mxu2  ;;  %4052 = vmatmul.bf16.vlgmr.msra.gmra.mxu1 %v2904_v21  ;;  %v5241_v31 = vld [vmem:[%s5652_s0 + $0x348] sm:$0xff] }
 0x91b   : > { %4096 = vmatpush.bf16.msrb.mxu1 %v5239_v26  ;;  %v2812_v43 = vadd.f32 %v2811_v39, %v2487_v18  ;;  %4091 = vmatmul.bf16.vlgmr.msrb.gmra.mxu0 %v2907_v33  ;;  %v2787_v37 = vpop.f32.mrf.mxu1  ;;  %v5232_v26 = vld [vmem:[%s5652_s0 + $0x300] sm:$0xff]  ;;  %v5249_v18 = vld [vmem:[%s5652_s0 + $0x388] sm:$0xff] }
 0x91c   : > { %4135 = vmatpush.bf16.msra.mxu0 %v5263_v7  ;;  %v2889_v44 = vmax.f32 %v2799_v38, 0.0  ;;  %v2826_v45 = vpop.f32.mrf.mxu0  ;;  %v5240_v33 = vld [vmem:[%s5652_s0 + $0x340] sm:$0xff] }
 0x91d   : > { %v2890_v46 = vmax.f32 %v2812_v43, 0.0  ;;  %4064 = vmatpush.bf16.msra.mxu3 %v5208_v36 }
 0x91e   : > { %v2905_v48 = vpack.c.bf16 %v2889_v44, %v2889_v44  ;;  %4077 = vmatpush.bf16.msrb.mxu2 %v5216_v40 }
 0x91f   : > { %4097 = vmatpush.bf16.msrb.mxu1 %v5238_v4  ;;  %v2906_v50 = vpack.c.bf16 %v2890_v46, %v2890_v46 }
 0x920   : > { %4136 = vmatpush.bf16.msra.mxu0 %v5262_v35  ;;  %4065 = vmatmul.bf16.vlgmr.msra.gmra.mxu3 %v2905_v48  ;;  %v5248_v35 = vld [vmem:[%s5652_s0 + $0x380] sm:$0xff] }
 0x921   : > { %4109 = vmatpush.bf16.msrb.mxu3 %v5247_v41  ;;  %4078 = vmatmul.bf16.vlgmr.msrb.gmra.mxu2 %v2906_v50  ;;  %v2800_v53 = vpop.f32.mrf.mxu3  ;;  %v5345_v50 = vld [vmem:[%s960_s7] ss:$0 sm:$0xff] }
 0x922   : > { %4122 = vmatpush.bf16.msra.mxu2 %v5255_v20  ;;  %v2813_v55 = vpop.f32.mrf.mxu2 }
 0x923   : > { %4098 = vmatpush.bf16.msrb.mxu1 %v5237_v42  ;;  %v2837_v57 = vpop.f32.mrf.mxu1 }
 0x924   : > { %4137 = vmatpush.bf16.msra.mxu0 %v5261_v47  ;;  %v2876_v9 = vpop.f32.mrf.mxu0  ;;  %v2838_v15 = vadd.f32 %v2837_v57, %v2489_v0 }
 0x925   : > { %4110 = vmatpush.bf16.msrb.mxu3 %v5246_v49  ;;  %v2877_v19 = vadd.f32 %v2876_v9, %v2492_v29 }
 0x926   : > { %4123 = vmatpush.bf16.msra.mxu2 %v5254_v51  ;;  %v2892_v27 = vmax.f32 %v2838_v15, 0.0 }
 0x927   : > { %4099 = vmatpush.bf16.msrb.mxu1 %v5236_v52  ;;  %v2895_v28 = vmax.f32 %v2877_v19, 0.0 }
 0x928   : > { %4138 = vmatpush.bf16.msra.mxu0 %v5260_v54  ;;  %v2908_v4 = vpack.c.bf16 %v2892_v27, %v2892_v27 }
 0x929   : > { %4111 = vmatpush.bf16.msrb.mxu3 %v5245_v56  ;;  %v2850_v2 = vpop.f32.mrf.mxu3  ;;  %v2911_v1 = vpack.c.bf16 %v2895_v28, %v2895_v28 }
 0x92a   : > { %4124 = vmatpush.bf16.msra.mxu2 %v5253_v58  ;;  %v2863_v6 = vpop.f32.mrf.mxu2  ;;  %v2851_v32 = vadd.f32 %v2850_v2, %v2490_v23 }
 0x92b   : > { %4100 = vmatpush.bf16.msrb.mxu1 %v5235_v59  ;;  %v2839_v8 = vpop.f32.mrf.mxu1  ;;  %v2864_v21 = vadd.f32 %v2863_v6, %v2491_v25 }
 0x92c   : > { %4139 = vmatpush.bf16.msra.mxu0 %v5259_v60  ;;  %v2878_v12 = vpop.f32.mrf.mxu0  ;;  %v2893_v34 = vmax.f32 %v2851_v32, 0.0 }
 0x92d   : > { %4112 = vmatpush.bf16.msrb.mxu3 %v5244_v61  ;;  %v2894_v36 = vmax.f32 %v2864_v21, 0.0 }
 0x92e   : > { %4125 = vmatpush.bf16.msra.mxu2 %v5252_v62  ;;  %v2909_v38 = vpack.c.bf16 %v2893_v34, %v2893_v34 }
 0x92f   : > { %4101 = vmatpush.bf16.msrb.mxu1 %v5234_v63  ;;  %v2910_v39 = vpack.c.bf16 %v2894_v36, %v2894_v36 }
 0x930   : > { %4140 = vmatpush.bf16.msra.mxu0 %v5258_v3 }
 0x931   : > { %4113 = vmatpush.bf16.msrb.mxu3 %v5243_v10  ;;  %v2852_v7 = vpop.f32.mrf.mxu3 }
 0x932   : > { %4126 = vmatpush.bf16.msra.mxu2 %v5251_v11  ;;  %v2865_v30 = vpop.f32.mrf.mxu2 }
 0x933   : > { %4102 = vmatpush.bf16.msrb.mxu1 %v5233_v14 }
 0x934   : > { %4141 = vmatpush.bf16.msra.mxu0 %v5257_v16 }
 0x935   : > { %4114 = vmatpush.bf16.msrb.mxu3 %v5242_v22 }
 0x936   : > { %4127 = vmatpush.bf16.msra.mxu2 %v5250_v24 }
 0x937   : > { %4103 = vmatpush.bf16.msrb.mxu1 %v5232_v26 }
 0x938   : > { %4142 = vmatpush.bf16.msra.mxu0 %v5256_v13 }
 0x939   : > { %4115 = vmatpush.bf16.msrb.mxu3 %v5241_v31 }
 0x93a   : > { %4128 = vmatpush.bf16.msra.mxu2 %v5249_v18  ;;  %4104 = vmatmul.bf16.vlgmr.msrb.gmra.mxu1 %v2908_v4 }
 0x93b   : > { %4143 = vmatmul.bf16.vlgmr.msra.gmra.mxu0 %v2911_v1 }
 0x93d   : > { %4116 = vmatpush.bf16.msrb.mxu3 %v5240_v33 }
 0x93e   : > { %4129 = vmatpush.bf16.msra.mxu2 %v5248_v35 }
 0x940   : > { %4117 = vmatmul.bf16.vlgmr.msrb.gmra.mxu3 %v2909_v38 }
 0x941   : > { %4130 = vmatmul.bf16.vlgmr.msra.gmra.mxu2 %v2910_v39 }
 0x977   : > { %v3949_v40 = vpop.f32.mrf.mxu1 }
 0x978   : > { %v3988_v41 = vpop.f32.mrf.mxu0  ;;  %v3950_v53 = vadd.f32 %v5345_v50, %v3949_v40 }
 0x97f   : > { %v3951_v43 = vpop.f32.mrf.mxu1 }
 0x980   : > { %v3990_v37 = vpop.f32.mrf.mxu0  ;;  %v5346_v43 = vld [vmem:[%s963_s6] ss:$0 sm:$0xff] }
 0x983   : > { %v3962_v20 = vpop.f32.mrf.mxu3 }
 0x984   : > { %v3975_v44 = vpop.f32.mrf.mxu2  ;;  %v3963_v56 = vadd.f32 %v3962_v20, %v3950_v53 }
 0x986   : > { %v3976_v9 = vadd.f32 %v3975_v44, %v3963_v56 }
 0x987   : > { %v4001_v45 = vpop.f32.mrf.mxu1 }
 0x988   : > { %v4040_v42 = vpop.f32.mrf.mxu0  ;;  %v3989_v61 = vadd.f32 %v3988_v41, %v3976_v9 }
 0x98a   : > { %v4002_v0 = vadd.f32 %v4001_v45, %v3989_v61 }
 0x98b   : > { %v3964_v46 = vpop.f32.mrf.mxu3 }
 0x98c   : > { %v3977_v47 = vpop.f32.mrf.mxu2 }
 0x98f   : > { %v4003_v48 = vpop.f32.mrf.mxu1 }
 0x990   : > { %v4042_v49 = vpop.f32.mrf.mxu0 }
 0x993   : > { %v4014_v51 = vpop.f32.mrf.mxu3 }
 0x994   : > { %v4027_v52 = vpop.f32.mrf.mxu2  ;;  %v4015_v2 = vadd.f32 %v4014_v51, %v4002_v0 }
 0x996   : > { %v4028_v3 = vadd.f32 %v4027_v52, %v4015_v2 }
 0x997   : > { %v4053_v54 = vpop.f32.mrf.mxu1 }
 0x998   : > { %v4092_v55 = vpop.f32.mrf.mxu0  ;;  %v4041_v10 = vadd.f32 %v4040_v42, %v4028_v3 }
 0x99a   : > { %v4054_v8 = vadd.f32 %v4053_v54, %v4041_v10 }
 0x99b   : > { %v4016_v57 = vpop.f32.mrf.mxu3 }
 0x99c   : > { %v4029_v58 = vpop.f32.mrf.mxu2 }
 0x99f   : > { %v4055_v59 = vpop.f32.mrf.mxu1 }
 0x9a0   : > { %v4094_v60 = vpop.f32.mrf.mxu0 }
 0x9a3   : > { %v4066_v62 = vpop.f32.mrf.mxu3 }
 0x9a4   : > { %v4079_v63 = vpop.f32.mrf.mxu2  ;;  %v4067_v12 = vadd.f32 %v4066_v62, %v4054_v8 }
 0x9a6   : > { %v4080_v15 = vadd.f32 %v4079_v63, %v4067_v12 }
 0x9a8   : > { %v4093_v19 = vadd.f32 %v4092_v55, %v4080_v15 }
 0x9ab   : > { %v4068_v29 = vpop.f32.mrf.mxu3 }
 0x9ac   : > { %v4081_v6 = vpop.f32.mrf.mxu2 }
 0x9b7   : > { %v4105_v11 = vpop.f32.mrf.mxu1 }
 0x9b8   : > { %v4144_v14 = vpop.f32.mrf.mxu0  ;;  %v4106_v23 = vadd.f32 %v4105_v11, %v4093_v19 }
 0x9bf   : > { %v4107_v16 = vpop.f32.mrf.mxu1 }
 0x9c0   : > { %v4146_v22 = vpop.f32.mrf.mxu0 }
 0x9c3   : > { %v4118_v24 = vpop.f32.mrf.mxu3 }
 0x9c4   : > { %v4119_v25 = vadd.f32 %v4118_v24, %v4106_v23  ;;  %v4131_v26 = vpop.f32.mrf.mxu2 }
 0x9c6   : > { %v4132_v27 = vadd.f32 %v4131_v26, %v4119_v25 }
 0x9c8   : > { %v4145_v7 = vadd.f32 %v4144_v14, %v4132_v27 }
 0x9ca   : > { %v4148_v13 = vadd.f32 %v4145_v7, %v5946_v17 }
 0x9cb   : > { %v4120_v28 = vpop.f32.mrf.mxu3 }
 0x9cc   : > { %v4133_v30 = vpop.f32.mrf.mxu2  ;;  %v4149_v31 = vsel %vm2099_vm15, %v4148_v13, 0.0 }
 0x9cd   : > { %4150 = vadd.xlane.f32.xlu0 %v4149_v31 }
 0xa40   : > { %v4151_v32 = vpop.xlane.xlu0 %4150 }
 0xa41   : > { %v4152_v18 = vmul.f32 %v4151_v32, %v5889_v5 }
 0xa43   : > { %v4153_v21 = vsub.f32 %v4148_v13, %v4152_v18 }
 0xa45   : > { %v4154_v4 = vmul.f32 %v4153_v21, %v4153_v21 }
 0xa47   : > { %v4155_v1 = vsel %vm2099_vm15, %v4154_v4, 0.0 }
 0xa48   : > { %4156 = vadd.xlane.f32.xlu2 %v4155_v1 }
 0xabb   : > { %v4157_v33 = vpop.xlane.xlu2 %4156 }
 0xabc   : > { %v4158_v34 = vmul.f32 %v4157_v33, %v5889_v5  ;;  %v5347_v5 = vld [vmem:[%s966_s23] ss:$0 sm:$0xff] }
 0xabe   : > { %v4159_v35 = vadd.f32 1e-05, %v4158_v34 }
 0xac0   : > { %5368 = vrsqrt.f32 %v4159_v35  ;;  %vm4166_vm9 = vweird.f32 %v4159_v35 }
 0xac6   : > { %v5369_v17 = vpop.eup %5368 }
 0xac7   : > { %v4161_v36 = vmul.f32 %v5369_v17, %v4159_v35  ;;  %vm4167_vm8 = vweird.f32 %v5369_v17 }
 0xac8   : > { %vm4168_vm10 = vmor %vm4166_vm9, %vm4167_vm8 }
 0xac9   : > { %v4162_v38 = vmul.f32 %v5369_v17, %v4161_v36 }
 0xacb   : > { %v4163_v39 = vmul.f32 0.5, %v4162_v38 }
 0xacd   : > { %v4164_v40 = vsub.f32 1.5, %v4163_v39 }
 0xacf   : > { %v4165_v41 = vmul.f32 %v5369_v17, %v4164_v40 }
 0xad1   : > { %v4169_v37 = vsel %vm4168_vm10, %v5369_v17, %v4165_v41 }
 0xad2   : > { %v4170_v20 = vmul.f32 %v4169_v37, %v4153_v21 }
 0xad4   : > { %v4175_v44 = vmul.f32 %v5346_v43, %v4170_v20  ;;  %4185 = sbr.rel (%p5093_p8) target bundleno = 2900 (0xb54), region = 128 }
 0xad6   : > { %v4180_v45 = vadd.f32 %v5347_v5, %v4175_v44 }
 0xad8   : > { %4181 = vst.msk [vmem:[#allocation2] sm:$0xff] %vm2099_vm15, %v4180_v45 }
 0xad9   : > { %v5370_v42 = vld [vmem:[%s6287_s10] ss:$0 sm:$0xff]  ;;  %v5371_v48 = vld [vmem:[#allocation4] ss:$0 sm:$0xff]  ;;  %vm4199_vm11 = vcmask 7168  }
 0xada   : > { %v4190_v46 = vmul.f32 %v5370_v42, %v4180_v45 }
 0xadc   : > { %v4191_v47 = vsel %vm2099_vm15, %v4190_v46, 0.0 }
 0xadd   : > { %4192 = vadd.xlane.f32.xlu0 %v4191_v47 }
 0xb50   : > { %v4193_v49 = vpop.xlane.xlu0 %4192 }
 0xb51   : > { %v4198_v50 = vadd.f32 %v5371_v48, %v4193_v49 }
 0xb53   : > { %4200 = vst.msk [vmem:[%s5669_s18] sm:$0xff] %vm4199_vm11, %v4198_v50 }
 0xb54 PF: > { %s6288_s28 = sld [smem:[#allocation8_spill]] }
 0xb55   : > { %s6289_s3 = sld [smem:[#allocation6_spill]] }
 0xb56   : > { %s6290_s26 = sld [smem:[#allocation7_spill]] }
 0xb57   : > { %s6291_s1 = sld [smem:[#allocation9_spill]] }
 0xb58   : > { %s6292_s8 = sld [smem:[#allocation10_spill]] }
 0xb5a   : > { %s39_s27 = sadd.s32 1, %s6288_s28  }
 0xb5b   : > { %p36_p9 = scmp.ge.s32.totalorder %s39_s27, 6  }
 0xb5d   :  { %38 = sbr.rel (!%p36_p9) target bundleno = 26 (0x1a), region = 194 }

</bundles_post_ra>
